<compile_context>
chip_gen: v6e
topology: v6e:2x2x1
jax: 0.10.0
libtpu: 0.0.40
codegen_flags: <defaults>
</compile_context>

<pallas_src>
import jax
import jax.numpy as jnp
from jax import lax
from jax.experimental import pallas as pl
from jax.experimental.pallas import tpu as pltpu


def lstm_fc_kernel(xm_ref, xr_ref, wxm_ref, wxr_ref, wh_ref, b_ref, wf_ref, bf_ref,
                   out_ref, gx_ref, hh_ref):
    """Single-layer LSTM (PyTorch gate order i, f, g, o) + Linear(H, 1).

    xm_ref : (T*Bp, 128)   time-major CNN features, bf16            (VMEM)
    xr_ref : (T*Bp, 1)     time-major BVP column, f32               (VMEM)
    wxm_ref: (128, 4*Hp)   W_ih^T CNN rows, gate-padded, bf16       (VMEM)
    wxr_ref: (1, 4*Hp)     W_ih^T BVP row, gate-padded, f32         (VMEM)
    wh_ref : (Hp, 4*Hp)    W_hh^T, gate-padded + zero rows, bf16    (VMEM)
    b_ref  : (1, 4*Hp)     b_ih + b_hh, gate-padded, f32            (VMEM)
    wf_ref : (1, Hp)       fc weight, zero-padded, f32              (VMEM)
    bf_ref : (1, 1)        fc bias, f32                             (VMEM)
    out_ref: (T, Bp)       per-timestep fc output, f32              (VMEM)
    gx_ref : (T*Bp, 4*Hp)  input-projection scratch, f32            (VMEM scratch)
    hh_ref : (T, Bp, Hp)   h-history scratch, f32                   (VMEM scratch)
    """
    T, Bp = out_ref.shape
    Hp = wh_ref.shape[0]

    # (1) Hoisted input projection for all T timesteps: clean 128-wide bf16
    #     matmul + rank-1 f32 fma for the ragged BVP column + bias.  Parked in
    #     VMEM scratch so it is not held live in vregs across the recurrence.
    gx_ref[...] = (
        jnp.dot(xm_ref[...], wxm_ref[...], preferred_element_type=jnp.float32)
        + xr_ref[...] * wxr_ref[...]
        + b_ref[...])

    h = jnp.zeros((Bp, Hp), jnp.float32)                  # h0 = 0
    c = jnp.zeros((Bp, Hp), jnp.float32)                  # c0 = 0

    # (2) Recurrence, fully unrolled (static T).  Only the h @ W_hh matmul and
    #     the gate math sit on the loop-carried dependency chain; gx loads and
    #     hh stores are off the chain.  W_hh is re-read from its ref each step
    #     (not hoisted) to avoid pinning ~32 vregs for the whole loop.
    for t in range(T):
        gates = gx_ref[t * Bp:(t + 1) * Bp, :] + jnp.dot(
            h.astype(jnp.bfloat16), wh_ref[...], preferred_element_type=jnp.float32)

        # lane-aligned gate slices (each gate occupies a full Hp=128-lane group)
        i_g = jax.nn.sigmoid(gates[:, 0 * Hp:1 * Hp])
        f_g = jax.nn.sigmoid(gates[:, 1 * Hp:2 * Hp])
        g_g = jnp.tanh(gates[:, 2 * Hp:3 * Hp])
        o_g = jax.nn.sigmoid(gates[:, 3 * Hp:4 * Hp])

        c = f_g * c + i_g * g_g
        h = o_g * jnp.tanh(c)
        hh_ref[t] = h                                     # whole-vreg aligned store

    # (3) Batched FC head after the loop: elementwise-mul + lane reduce against
    #     the 1-wide fc weight, then a single store.
    out_ref[...] = jnp.sum(hh_ref[...] * wf_ref[...], axis=-1) + bf_ref[...]


def _pad_gate_cols(w, H, Hp):
    """(R, 4*H) -> (R, 4*Hp): each gate block moved to an aligned Hp-lane group."""
    R = w.shape[0]
    w4 = w.reshape(R, 4, H)
    w4 = jnp.pad(w4, ((0, 0), (0, 0), (0, Hp - H)))
    return w4.reshape(R, 4 * Hp)


@jax.jit
def simple_rnn_forward(x, wx, wh, b, wf, bf):
    """x: (B, T, D) f32; wx=(D,4H)=W_ih^T; wh=(H,4H)=W_hh^T; b=(4H,)=b_ih+b_hh;
    wf=(H,1)=fc.weight^T; bf=(1,) -> returns (B, T) f32."""
    B, T, D = x.shape
    H = wh.shape[0]
    Hp = max(128, ((H + 127) // 128) * 128)   # lane-aligned per-gate width
    Bp = max(8, ((B + 7) // 8) * 8)           # sublane-aligned batch
    Dm = (D // 128) * 128                     # clean 128-wide contraction
    assert D - Dm == 1, "kernel assumes cnn_feature_dim % 128 == 0, bvp_feature_dim == 1"

    # Gate-aligned, zero-padded parameter layouts (tiny; cached once per model
    # in a real deployment).
    wx_p = _pad_gate_cols(wx, H, Hp)                                    # (D, 4Hp) f32
    wx_main = wx_p[:Dm].astype(jnp.bfloat16)                            # (128, 4Hp) bf16
    wx_rem = wx_p[Dm:]                                                  # (1, 4Hp) f32
    wh_p = jnp.pad(_pad_gate_cols(wh, H, Hp), ((0, Hp - H), (0, 0)))    # (Hp, 4Hp)
    wh_p = wh_p.astype(jnp.bfloat16)                                    # bf16 MXU operand
    b_p = _pad_gate_cols(b.reshape(1, 4 * H), H, Hp)                    # (1, 4Hp) f32
    wf_p = jnp.pad(wf.reshape(1, H), ((0, 0), (0, Hp - H)))             # (1, Hp) f32
    bf_p = bf.reshape(1, 1)                                             # (1, 1) f32

    # Batch-pad to the f32 sublane tile (whole-vreg per-step slices/stores) and
    # go time-major for the single hoisted input projection.
    x_p = jnp.pad(x, ((0, Bp - B), (0, 0), (0, 0)))                     # (Bp, T, D)
    x_tm = jnp.swapaxes(x_p, 0, 1).reshape(T * Bp, D)                   # (T*Bp, D)
    x_main = x_tm[:, :Dm].astype(jnp.bfloat16)                          # (T*Bp, 128) bf16
    x_rem = x_tm[:, Dm:]                                                # (T*Bp, 1) f32

    vmem = pl.BlockSpec(memory_space=pltpu.MemorySpace.VMEM)
    out_tm = pl.pallas_call(
        lstm_fc_kernel,
        out_shape=jax.ShapeDtypeStruct((T, Bp), jnp.float32),
        in_specs=[vmem] * 8,
        out_specs=vmem,
        scratch_shapes=[
            pltpu.VMEM((T * Bp, 4 * Hp), jnp.float32),   # gx scratch (input projection)
            pltpu.VMEM((T, Bp, Hp), jnp.float32),        # h history for batched FC head
        ],
    )(x_main, x_rem, wx_main, wx_rem, wh_p, b_p, wf_p, bf_p)

    # Drop padded batch rows (they carry bias-driven state) and return (B, T).
    return jnp.swapaxes(out_tm[:, :B], 0, 1)


def simple_rnn_reference(x, wx, wh, b, wf, bf):
    """Pure-JAX f32 reference (same math as nn.LSTM + nn.Linear)."""
    B, T, D = x.shape
    H = wh.shape[0]

    def step(carry, x_t):
        h, c = carry
        gates = x_t @ wx + h @ wh + b
        i_g = jax.nn.sigmoid(gates[:, 0 * H:1 * H])
        f_g = jax.nn.sigmoid(gates[:, 1 * H:2 * H])
        g_g = jnp.tanh(gates[:, 2 * H:3 * H])
        o_g = jax.nn.sigmoid(gates[:, 3 * H:4 * H])
        c = f_g * c + i_g * g_g
        h = o_g * jnp.tanh(c)
        y = (h @ wf + bf.reshape(1, 1))[:, 0]
        return (h, c), y

    init = (jnp.zeros((B, H), jnp.float32), jnp.zeros((B, H), jnp.float32))
    _, ys = lax.scan(step, init, jnp.swapaxes(x, 0, 1))
    return jnp.swapaxes(ys, 0, 1)


if __name__ == "__main__":
    # Module hyperparameters (matching SimpleRNN defaults).
    CNN_DIM, BVP_DIM, HIDDEN = 128, 1, 64
    D = CNN_DIM + BVP_DIM            # 129
    B, T = 2, 8

    key = jax.random.PRNGKey(0)
    k_x, k_wih, k_whh, k_bih, k_bhh, k_wfc, k_bfc = jax.random.split(key, 7)

    scale = 1.0 / jnp.sqrt(HIDDEN)
    # Deterministic synthetic parameters (PyTorch-style uniform init, pre-transposed).
    wx = jax.random.uniform(k_wih, (D, 4 * HIDDEN), jnp.float32, -scale, scale)       # W_ih^T
    wh = jax.random.uniform(k_whh, (HIDDEN, 4 * HIDDEN), jnp.float32, -scale, scale)  # W_hh^T
    b = (jax.random.uniform(k_bih, (4 * HIDDEN,), jnp.float32, -scale, scale)
         + jax.random.uniform(k_bhh, (4 * HIDDEN,), jnp.float32, -scale, scale))      # b_ih + b_hh
    wf = jax.random.uniform(k_wfc, (HIDDEN, 1), jnp.float32, -scale, scale)           # fc.weight^T
    bf = jax.random.uniform(k_bfc, (1,), jnp.float32, -scale, scale)                  # fc.bias

    x = jax.random.normal(k_x, (B, T, D), jnp.float32)

    out = simple_rnn_forward(x, wx, wh, b, wf, bf)
    out = jax.block_until_ready(out)
    assert out.shape == (B, T), out.shape

    ref = jax.block_until_ready(simple_rnn_reference(x, wx, wh, b, wf, bf))
    # bf16 operands are used for the (one-time) input projection and the recurrent
    # h @ W_hh matmul, both with f32 accumulation; all gate/elementwise math is f32.
    # Observed error is a few 1e-3; tolerance 2e-2.
    assert jnp.allclose(out, ref, rtol=2e-2, atol=2e-2), (
        f"max abs err = {jnp.max(jnp.abs(out - ref))}")

    print("KERNEL_OK")
</pallas_src>

<mosaic_0001>
module attributes {stable_mosaic.version = 11 : i64} {
  func.func @lstm_fc_kernel(%arg0: memref<64x128xbf16, #tpu.memory_space<vmem>>, %arg1: memref<64x1xf32, #tpu.memory_space<vmem>>, %arg2: memref<128x512xbf16, #tpu.memory_space<vmem>>, %arg3: memref<1x512xf32, #tpu.memory_space<vmem>>, %arg4: memref<128x512xbf16, #tpu.memory_space<vmem>>, %arg5: memref<1x512xf32, #tpu.memory_space<vmem>>, %arg6: memref<1x128xf32, #tpu.memory_space<vmem>>, %arg7: memref<1x1xf32, #tpu.memory_space<vmem>>, %arg8: memref<8x8xf32, #tpu.memory_space<vmem>>, %arg9: memref<64x512xf32, #tpu.memory_space<vmem>>, %arg10: memref<8x8x128xf32, #tpu.memory_space<vmem>>) attributes {dimension_semantics = [], scalar_prefetch = 0 : i64, scratch_operands = 2 : i64, tpu.core_type = #tpu.core_type<tc>} {
    %c0 = arith.constant 0 : index
    %c0_0 = arith.constant 0 : index
    %0 = vector.load %arg0[%c0, %c0_0] : memref<64x128xbf16, #tpu.memory_space<vmem>>, vector<64x128xbf16>
    %c0_1 = arith.constant 0 : index
    %c0_2 = arith.constant 0 : index
    %1 = vector.load %arg2[%c0_1, %c0_2] : memref<128x512xbf16, #tpu.memory_space<vmem>>, vector<128x512xbf16>
    %cst = arith.constant dense<0.000000e+00> : vector<64x512xf32>
    %2 = tpu.matmul %0, %1, %cst {dimension_numbers = #tpu.dot_dimension_numbers<[1], [0], [0], [1], [0, 0, 1, 1], [], []>} : vector<64x128xbf16>, vector<128x512xbf16>, vector<64x512xf32> -> vector<64x512xf32>
    %c0_3 = arith.constant 0 : index
    %c0_4 = arith.constant 0 : index
    %3 = vector.load %arg1[%c0_3, %c0_4] : memref<64x1xf32, #tpu.memory_space<vmem>>, vector<64x1xf32>
    %c0_5 = arith.constant 0 : index
    %c0_6 = arith.constant 0 : index
    %4 = vector.load %arg3[%c0_5, %c0_6] : memref<1x512xf32, #tpu.memory_space<vmem>>, vector<1x512xf32>
    %5 = vector.broadcast %3 : vector<64x1xf32> to vector<64x512xf32>
    %6 = vector.broadcast %4 : vector<1x512xf32> to vector<64x512xf32>
    %7 = arith.mulf %5, %6 : vector<64x512xf32>
    %8 = arith.addf %2, %7 : vector<64x512xf32>
    %c0_7 = arith.constant 0 : index
    %c0_8 = arith.constant 0 : index
    %9 = vector.load %arg5[%c0_7, %c0_8] : memref<1x512xf32, #tpu.memory_space<vmem>>, vector<1x512xf32>
    %10 = vector.broadcast %9 : vector<1x512xf32> to vector<64x512xf32>
    %11 = arith.addf %8, %10 : vector<64x512xf32>
    %c0_9 = arith.constant 0 : index
    %c0_10 = arith.constant 0 : index
    %12 = vector.load %arg9[%c0_9, %c0_10] : memref<64x512xf32, #tpu.memory_space<vmem>>, vector<64x512xf32>
    tpu.vector_store %arg9[%c0_9, %c0_10], %11 {strides = array<i32>} : memref<64x512xf32, #tpu.memory_space<vmem>>, vector<64x512xf32>,
    %cst_11 = arith.constant 0.000000e+00 : f32
    %13 = vector.broadcast %cst_11 : f32 to vector<8x128xf32>
    %cst_12 = arith.constant 0.000000e+00 : f32
    %14 = vector.broadcast %cst_12 : f32 to vector<8x128xf32>
    %c0_13 = arith.constant 0 : index
    %c0_14 = arith.constant 0 : index
    %15 = vector.load %arg9[%c0_13, %c0_14] : memref<64x512xf32, #tpu.memory_space<vmem>>, vector<8x512xf32>
    %16 = arith.truncf %13 : vector<8x128xf32> to vector<8x128xbf16>
    %c0_15 = arith.constant 0 : index
    %c0_16 = arith.constant 0 : index
    %17 = vector.load %arg4[%c0_15, %c0_16] : memref<128x512xbf16, #tpu.memory_space<vmem>>, vector<128x512xbf16>
    %cst_17 = arith.constant dense<0.000000e+00> : vector<8x512xf32>
    %18 = tpu.matmul %16, %17, %cst_17 {dimension_numbers = #tpu.dot_dimension_numbers<[1], [0], [0], [1], [0, 0, 1, 1], [], []>} : vector<8x128xbf16>, vector<128x512xbf16>, vector<8x512xf32> -> vector<8x512xf32>
    %19 = arith.addf %15, %18 : vector<8x512xf32>
    %20 = vector.extract_strided_slice %19 {offsets = [0, 0], sizes = [8, 128], strides = [1, 1]} : vector<8x512xf32> to vector<8x128xf32>
    %21 = arith.negf %20 : vector<8x128xf32>
    %22 = math.exp %21 : vector<8x128xf32>
    %cst_18 = arith.constant 1.000000e+00 : f32
    %23 = vector.broadcast %cst_18 : f32 to vector<8x128xf32>
    %24 = arith.addf %23, %22 : vector<8x128xf32>
    %25 = arith.divf %23, %24 : vector<8x128xf32>
    %26 = vector.extract_strided_slice %19 {offsets = [0, 128], sizes = [8, 128], strides = [1, 1]} : vector<8x512xf32> to vector<8x128xf32>
    %27 = arith.negf %26 : vector<8x128xf32>
    %28 = math.exp %27 : vector<8x128xf32>
    %cst_19 = arith.constant 1.000000e+00 : f32
    %29 = vector.broadcast %cst_19 : f32 to vector<8x128xf32>
    %30 = arith.addf %29, %28 : vector<8x128xf32>
    %31 = arith.divf %29, %30 : vector<8x128xf32>
    %32 = vector.extract_strided_slice %19 {offsets = [0, 256], sizes = [8, 128], strides = [1, 1]} : vector<8x512xf32> to vector<8x128xf32>
    %33 = math.tanh %32 : vector<8x128xf32>
    %34 = vector.extract_strided_slice %19 {offsets = [0, 384], sizes = [8, 128], strides = [1, 1]} : vector<8x512xf32> to vector<8x128xf32>
    %35 = arith.negf %34 : vector<8x128xf32>
    %36 = math.exp %35 : vector<8x128xf32>
    %cst_20 = arith.constant 1.000000e+00 : f32
    %37 = vector.broadcast %cst_20 : f32 to vector<8x128xf32>
    %38 = arith.addf %37, %36 : vector<8x128xf32>
    %39 = arith.divf %37, %38 : vector<8x128xf32>
    %40 = arith.mulf %31, %14 : vector<8x128xf32>
    %41 = arith.mulf %25, %33 : vector<8x128xf32>
    %42 = arith.addf %40, %41 : vector<8x128xf32>
    %43 = math.tanh %42 : vector<8x128xf32>
    %44 = arith.mulf %39, %43 : vector<8x128xf32>
    %c0_21 = arith.constant 0 : index
    %c0_22 = arith.constant 0 : index
    %c0_23 = arith.constant 0 : index
    %45 = vector.load %arg10[%c0_21, %c0_22, %c0_23] : memref<8x8x128xf32, #tpu.memory_space<vmem>>, vector<1x8x128xf32>
    %46 = vector.shape_cast %45 : vector<1x8x128xf32> to vector<8x128xf32>
    %47 = vector.shape_cast %44 : vector<8x128xf32> to vector<1x8x128xf32>
    tpu.vector_store %arg10[%c0_21, %c0_22, %c0_23], %47 {strides = array<i32>} : memref<8x8x128xf32, #tpu.memory_space<vmem>>, vector<1x8x128xf32>,
    %c8 = arith.constant 8 : index
    %c0_24 = arith.constant 0 : index
    %48 = vector.load %arg9[%c8, %c0_24] : memref<64x512xf32, #tpu.memory_space<vmem>>, vector<8x512xf32>
    %49 = arith.truncf %44 : vector<8x128xf32> to vector<8x128xbf16>
    %c0_25 = arith.constant 0 : index
    %c0_26 = arith.constant 0 : index
    %50 = vector.load %arg4[%c0_25, %c0_26] : memref<128x512xbf16, #tpu.memory_space<vmem>>, vector<128x512xbf16>
    %cst_27 = arith.constant dense<0.000000e+00> : vector<8x512xf32>
    %51 = tpu.matmul %49, %50, %cst_27 {dimension_numbers = #tpu.dot_dimension_numbers<[1], [0], [0], [1], [0, 0, 1, 1], [], []>} : vector<8x128xbf16>, vector<128x512xbf16>, vector<8x512xf32> -> vector<8x512xf32>
    %52 = arith.addf %48, %51 : vector<8x512xf32>
    %53 = vector.extract_strided_slice %52 {offsets = [0, 0], sizes = [8, 128], strides = [1, 1]} : vector<8x512xf32> to vector<8x128xf32>
    %54 = arith.negf %53 : vector<8x128xf32>
    %55 = math.exp %54 : vector<8x128xf32>
    %cst_28 = arith.constant 1.000000e+00 : f32
    %56 = vector.broadcast %cst_28 : f32 to vector<8x128xf32>
    %57 = arith.addf %56, %55 : vector<8x128xf32>
    %58 = arith.divf %56, %57 : vector<8x128xf32>
    %59 = vector.extract_strided_slice %52 {offsets = [0, 128], sizes = [8, 128], strides = [1, 1]} : vector<8x512xf32> to vector<8x128xf32>
    %60 = arith.negf %59 : vector<8x128xf32>
    %61 = math.exp %60 : vector<8x128xf32>
    %cst_29 = arith.constant 1.000000e+00 : f32
    %62 = vector.broadcast %cst_29 : f32 to vector<8x128xf32>
    %63 = arith.addf %62, %61 : vector<8x128xf32>
    %64 = arith.divf %62, %63 : vector<8x128xf32>
    %65 = vector.extract_strided_slice %52 {offsets = [0, 256], sizes = [8, 128], strides = [1, 1]} : vector<8x512xf32> to vector<8x128xf32>
    %66 = math.tanh %65 : vector<8x128xf32>
    %67 = vector.extract_strided_slice %52 {offsets = [0, 384], sizes = [8, 128], strides = [1, 1]} : vector<8x512xf32> to vector<8x128xf32>
    %68 = arith.negf %67 : vector<8x128xf32>
    %69 = math.exp %68 : vector<8x128xf32>
    %cst_30 = arith.constant 1.000000e+00 : f32
    %70 = vector.broadcast %cst_30 : f32 to vector<8x128xf32>
    %71 = arith.addf %70, %69 : vector<8x128xf32>
    %72 = arith.divf %70, %71 : vector<8x128xf32>
    %73 = arith.mulf %64, %42 : vector<8x128xf32>
    %74 = arith.mulf %58, %66 : vector<8x128xf32>
    %75 = arith.addf %73, %74 : vector<8x128xf32>
    %76 = math.tanh %75 : vector<8x128xf32>
    %77 = arith.mulf %72, %76 : vector<8x128xf32>
    %c1 = arith.constant 1 : index
    %c0_31 = arith.constant 0 : index
    %c0_32 = arith.constant 0 : index
    %78 = vector.load %arg10[%c1, %c0_31, %c0_32] : memref<8x8x128xf32, #tpu.memory_space<vmem>>, vector<1x8x128xf32>
    %79 = vector.shape_cast %78 : vector<1x8x128xf32> to vector<8x128xf32>
    %80 = vector.shape_cast %77 : vector<8x128xf32> to vector<1x8x128xf32>
    tpu.vector_store %arg10[%c1, %c0_31, %c0_32], %80 {strides = array<i32>} : memref<8x8x128xf32, #tpu.memory_space<vmem>>, vector<1x8x128xf32>,
    %c16 = arith.constant 16 : index
    %c0_33 = arith.constant 0 : index
    %81 = vector.load %arg9[%c16, %c0_33] : memref<64x512xf32, #tpu.memory_space<vmem>>, vector<8x512xf32>
    %82 = arith.truncf %77 : vector<8x128xf32> to vector<8x128xbf16>
    %c0_34 = arith.constant 0 : index
    %c0_35 = arith.constant 0 : index
    %83 = vector.load %arg4[%c0_34, %c0_35] : memref<128x512xbf16, #tpu.memory_space<vmem>>, vector<128x512xbf16>
    %cst_36 = arith.constant dense<0.000000e+00> : vector<8x512xf32>
    %84 = tpu.matmul %82, %83, %cst_36 {dimension_numbers = #tpu.dot_dimension_numbers<[1], [0], [0], [1], [0, 0, 1, 1], [], []>} : vector<8x128xbf16>, vector<128x512xbf16>, vector<8x512xf32> -> vector<8x512xf32>
    %85 = arith.addf %81, %84 : vector<8x512xf32>
    %86 = vector.extract_strided_slice %85 {offsets = [0, 0], sizes = [8, 128], strides = [1, 1]} : vector<8x512xf32> to vector<8x128xf32>
    %87 = arith.negf %86 : vector<8x128xf32>
    %88 = math.exp %87 : vector<8x128xf32>
    %cst_37 = arith.constant 1.000000e+00 : f32
    %89 = vector.broadcast %cst_37 : f32 to vector<8x128xf32>
    %90 = arith.addf %89, %88 : vector<8x128xf32>
    %91 = arith.divf %89, %90 : vector<8x128xf32>
    %92 = vector.extract_strided_slice %85 {offsets = [0, 128], sizes = [8, 128], strides = [1, 1]} : vector<8x512xf32> to vector<8x128xf32>
    %93 = arith.negf %92 : vector<8x128xf32>
    %94 = math.exp %93 : vector<8x128xf32>
    %cst_38 = arith.constant 1.000000e+00 : f32
    %95 = vector.broadcast %cst_38 : f32 to vector<8x128xf32>
    %96 = arith.addf %95, %94 : vector<8x128xf32>
    %97 = arith.divf %95, %96 : vector<8x128xf32>
    %98 = vector.extract_strided_slice %85 {offsets = [0, 256], sizes = [8, 128], strides = [1, 1]} : vector<8x512xf32> to vector<8x128xf32>
    %99 = math.tanh %98 : vector<8x128xf32>
    %100 = vector.extract_strided_slice %85 {offsets = [0, 384], sizes = [8, 128], strides = [1, 1]} : vector<8x512xf32> to vector<8x128xf32>
    %101 = arith.negf %100 : vector<8x128xf32>
    %102 = math.exp %101 : vector<8x128xf32>
    %cst_39 = arith.constant 1.000000e+00 : f32
    %103 = vector.broadcast %cst_39 : f32 to vector<8x128xf32>
    %104 = arith.addf %103, %102 : vector<8x128xf32>
    %105 = arith.divf %103, %104 : vector<8x128xf32>
    %106 = arith.mulf %97, %75 : vector<8x128xf32>
    %107 = arith.mulf %91, %99 : vector<8x128xf32>
    %108 = arith.addf %106, %107 : vector<8x128xf32>
    %109 = math.tanh %108 : vector<8x128xf32>
    %110 = arith.mulf %105, %109 : vector<8x128xf32>
    %c2 = arith.constant 2 : index
    %c0_40 = arith.constant 0 : index
    %c0_41 = arith.constant 0 : index
    %111 = vector.load %arg10[%c2, %c0_40, %c0_41] : memref<8x8x128xf32, #tpu.memory_space<vmem>>, vector<1x8x128xf32>
    %112 = vector.shape_cast %111 : vector<1x8x128xf32> to vector<8x128xf32>
    %113 = vector.shape_cast %110 : vector<8x128xf32> to vector<1x8x128xf32>
    tpu.vector_store %arg10[%c2, %c0_40, %c0_41], %113 {strides = array<i32>} : memref<8x8x128xf32, #tpu.memory_space<vmem>>, vector<1x8x128xf32>,
    %c24 = arith.constant 24 : index
    %c0_42 = arith.constant 0 : index
    %114 = vector.load %arg9[%c24, %c0_42] : memref<64x512xf32, #tpu.memory_space<vmem>>, vector<8x512xf32>
    %115 = arith.truncf %110 : vector<8x128xf32> to vector<8x128xbf16>
    %c0_43 = arith.constant 0 : index
    %c0_44 = arith.constant 0 : index
    %116 = vector.load %arg4[%c0_43, %c0_44] : memref<128x512xbf16, #tpu.memory_space<vmem>>, vector<128x512xbf16>
    %cst_45 = arith.constant dense<0.000000e+00> : vector<8x512xf32>
    %117 = tpu.matmul %115, %116, %cst_45 {dimension_numbers = #tpu.dot_dimension_numbers<[1], [0], [0], [1], [0, 0, 1, 1], [], []>} : vector<8x128xbf16>, vector<128x512xbf16>, vector<8x512xf32> -> vector<8x512xf32>
    %118 = arith.addf %114, %117 : vector<8x512xf32>
    %119 = vector.extract_strided_slice %118 {offsets = [0, 0], sizes = [8, 128], strides = [1, 1]} : vector<8x512xf32> to vector<8x128xf32>
    %120 = arith.negf %119 : vector<8x128xf32>
    %121 = math.exp %120 : vector<8x128xf32>
    %cst_46 = arith.constant 1.000000e+00 : f32
    %122 = vector.broadcast %cst_46 : f32 to vector<8x128xf32>
    %123 = arith.addf %122, %121 : vector<8x128xf32>
    %124 = arith.divf %122, %123 : vector<8x128xf32>
    %125 = vector.extract_strided_slice %118 {offsets = [0, 128], sizes = [8, 128], strides = [1, 1]} : vector<8x512xf32> to vector<8x128xf32>
    %126 = arith.negf %125 : vector<8x128xf32>
    %127 = math.exp %126 : vector<8x128xf32>
    %cst_47 = arith.constant 1.000000e+00 : f32
    %128 = vector.broadcast %cst_47 : f32 to vector<8x128xf32>
    %129 = arith.addf %128, %127 : vector<8x128xf32>
    %130 = arith.divf %128, %129 : vector<8x128xf32>
    %131 = vector.extract_strided_slice %118 {offsets = [0, 256], sizes = [8, 128], strides = [1, 1]} : vector<8x512xf32> to vector<8x128xf32>
    %132 = math.tanh %131 : vector<8x128xf32>
    %133 = vector.extract_strided_slice %118 {offsets = [0, 384], sizes = [8, 128], strides = [1, 1]} : vector<8x512xf32> to vector<8x128xf32>
    %134 = arith.negf %133 : vector<8x128xf32>
    %135 = math.exp %134 : vector<8x128xf32>
    %cst_48 = arith.constant 1.000000e+00 : f32
    %136 = vector.broadcast %cst_48 : f32 to vector<8x128xf32>
    %137 = arith.addf %136, %135 : vector<8x128xf32>
    %138 = arith.divf %136, %137 : vector<8x128xf32>
    %139 = arith.mulf %130, %108 : vector<8x128xf32>
    %140 = arith.mulf %124, %132 : vector<8x128xf32>
    %141 = arith.addf %139, %140 : vector<8x128xf32>
    %142 = math.tanh %141 : vector<8x128xf32>
    %143 = arith.mulf %138, %142 : vector<8x128xf32>
    %c3 = arith.constant 3 : index
    %c0_49 = arith.constant 0 : index
    %c0_50 = arith.constant 0 : index
    %144 = vector.load %arg10[%c3, %c0_49, %c0_50] : memref<8x8x128xf32, #tpu.memory_space<vmem>>, vector<1x8x128xf32>
    %145 = vector.shape_cast %144 : vector<1x8x128xf32> to vector<8x128xf32>
    %146 = vector.shape_cast %143 : vector<8x128xf32> to vector<1x8x128xf32>
    tpu.vector_store %arg10[%c3, %c0_49, %c0_50], %146 {strides = array<i32>} : memref<8x8x128xf32, #tpu.memory_space<vmem>>, vector<1x8x128xf32>,
    %c32 = arith.constant 32 : index
    %c0_51 = arith.constant 0 : index
    %147 = vector.load %arg9[%c32, %c0_51] : memref<64x512xf32, #tpu.memory_space<vmem>>, vector<8x512xf32>
    %148 = arith.truncf %143 : vector<8x128xf32> to vector<8x128xbf16>
    %c0_52 = arith.constant 0 : index
    %c0_53 = arith.constant 0 : index
    %149 = vector.load %arg4[%c0_52, %c0_53] : memref<128x512xbf16, #tpu.memory_space<vmem>>, vector<128x512xbf16>
    %cst_54 = arith.constant dense<0.000000e+00> : vector<8x512xf32>
    %150 = tpu.matmul %148, %149, %cst_54 {dimension_numbers = #tpu.dot_dimension_numbers<[1], [0], [0], [1], [0, 0, 1, 1], [], []>} : vector<8x128xbf16>, vector<128x512xbf16>, vector<8x512xf32> -> vector<8x512xf32>
    %151 = arith.addf %147, %150 : vector<8x512xf32>
    %152 = vector.extract_strided_slice %151 {offsets = [0, 0], sizes = [8, 128], strides = [1, 1]} : vector<8x512xf32> to vector<8x128xf32>
    %153 = arith.negf %152 : vector<8x128xf32>
    %154 = math.exp %153 : vector<8x128xf32>
    %cst_55 = arith.constant 1.000000e+00 : f32
    %155 = vector.broadcast %cst_55 : f32 to vector<8x128xf32>
    %156 = arith.addf %155, %154 : vector<8x128xf32>
    %157 = arith.divf %155, %156 : vector<8x128xf32>
    %158 = vector.extract_strided_slice %151 {offsets = [0, 128], sizes = [8, 128], strides = [1, 1]} : vector<8x512xf32> to vector<8x128xf32>
    %159 = arith.negf %158 : vector<8x128xf32>
    %160 = math.exp %159 : vector<8x128xf32>
    %cst_56 = arith.constant 1.000000e+00 : f32
    %161 = vector.broadcast %cst_56 : f32 to vector<8x128xf32>
    %162 = arith.addf %161, %160 : vector<8x128xf32>
    %163 = arith.divf %161, %162 : vector<8x128xf32>
    %164 = vector.extract_strided_slice %151 {offsets = [0, 256], sizes = [8, 128], strides = [1, 1]} : vector<8x512xf32> to vector<8x128xf32>
    %165 = math.tanh %164 : vector<8x128xf32>
    %166 = vector.extract_strided_slice %151 {offsets = [0, 384], sizes = [8, 128], strides = [1, 1]} : vector<8x512xf32> to vector<8x128xf32>
    %167 = arith.negf %166 : vector<8x128xf32>
    %168 = math.exp %167 : vector<8x128xf32>
    %cst_57 = arith.constant 1.000000e+00 : f32
    %169 = vector.broadcast %cst_57 : f32 to vector<8x128xf32>
    %170 = arith.addf %169, %168 : vector<8x128xf32>
    %171 = arith.divf %169, %170 : vector<8x128xf32>
    %172 = arith.mulf %163, %141 : vector<8x128xf32>
    %173 = arith.mulf %157, %165 : vector<8x128xf32>
    %174 = arith.addf %172, %173 : vector<8x128xf32>
    %175 = math.tanh %174 : vector<8x128xf32>
    %176 = arith.mulf %171, %175 : vector<8x128xf32>
    %c4 = arith.constant 4 : index
    %c0_58 = arith.constant 0 : index
    %c0_59 = arith.constant 0 : index
    %177 = vector.load %arg10[%c4, %c0_58, %c0_59] : memref<8x8x128xf32, #tpu.memory_space<vmem>>, vector<1x8x128xf32>
    %178 = vector.shape_cast %177 : vector<1x8x128xf32> to vector<8x128xf32>
    %179 = vector.shape_cast %176 : vector<8x128xf32> to vector<1x8x128xf32>
    tpu.vector_store %arg10[%c4, %c0_58, %c0_59], %179 {strides = array<i32>} : memref<8x8x128xf32, #tpu.memory_space<vmem>>, vector<1x8x128xf32>,
    %c40 = arith.constant 40 : index
    %c0_60 = arith.constant 0 : index
    %180 = vector.load %arg9[%c40, %c0_60] : memref<64x512xf32, #tpu.memory_space<vmem>>, vector<8x512xf32>
    %181 = arith.truncf %176 : vector<8x128xf32> to vector<8x128xbf16>
    %c0_61 = arith.constant 0 : index
    %c0_62 = arith.constant 0 : index
    %182 = vector.load %arg4[%c0_61, %c0_62] : memref<128x512xbf16, #tpu.memory_space<vmem>>, vector<128x512xbf16>
    %cst_63 = arith.constant dense<0.000000e+00> : vector<8x512xf32>
    %183 = tpu.matmul %181, %182, %cst_63 {dimension_numbers = #tpu.dot_dimension_numbers<[1], [0], [0], [1], [0, 0, 1, 1], [], []>} : vector<8x128xbf16>, vector<128x512xbf16>, vector<8x512xf32> -> vector<8x512xf32>
    %184 = arith.addf %180, %183 : vector<8x512xf32>
    %185 = vector.extract_strided_slice %184 {offsets = [0, 0], sizes = [8, 128], strides = [1, 1]} : vector<8x512xf32> to vector<8x128xf32>
    %186 = arith.negf %185 : vector<8x128xf32>
    %187 = math.exp %186 : vector<8x128xf32>
    %cst_64 = arith.constant 1.000000e+00 : f32
    %188 = vector.broadcast %cst_64 : f32 to vector<8x128xf32>
    %189 = arith.addf %188, %187 : vector<8x128xf32>
    %190 = arith.divf %188, %189 : vector<8x128xf32>
    %191 = vector.extract_strided_slice %184 {offsets = [0, 128], sizes = [8, 128], strides = [1, 1]} : vector<8x512xf32> to vector<8x128xf32>
    %192 = arith.negf %191 : vector<8x128xf32>
    %193 = math.exp %192 : vector<8x128xf32>
    %cst_65 = arith.constant 1.000000e+00 : f32
    %194 = vector.broadcast %cst_65 : f32 to vector<8x128xf32>
    %195 = arith.addf %194, %193 : vector<8x128xf32>
    %196 = arith.divf %194, %195 : vector<8x128xf32>
    %197 = vector.extract_strided_slice %184 {offsets = [0, 256], sizes = [8, 128], strides = [1, 1]} : vector<8x512xf32> to vector<8x128xf32>
    %198 = math.tanh %197 : vector<8x128xf32>
    %199 = vector.extract_strided_slice %184 {offsets = [0, 384], sizes = [8, 128], strides = [1, 1]} : vector<8x512xf32> to vector<8x128xf32>
    %200 = arith.negf %199 : vector<8x128xf32>
    %201 = math.exp %200 : vector<8x128xf32>
    %cst_66 = arith.constant 1.000000e+00 : f32
    %202 = vector.broadcast %cst_66 : f32 to vector<8x128xf32>
    %203 = arith.addf %202, %201 : vector<8x128xf32>
    %204 = arith.divf %202, %203 : vector<8x128xf32>
    %205 = arith.mulf %196, %174 : vector<8x128xf32>
    %206 = arith.mulf %190, %198 : vector<8x128xf32>
    %207 = arith.addf %205, %206 : vector<8x128xf32>
    %208 = math.tanh %207 : vector<8x128xf32>
    %209 = arith.mulf %204, %208 : vector<8x128xf32>
    %c5 = arith.constant 5 : index
    %c0_67 = arith.constant 0 : index
    %c0_68 = arith.constant 0 : index
    %210 = vector.load %arg10[%c5, %c0_67, %c0_68] : memref<8x8x128xf32, #tpu.memory_space<vmem>>, vector<1x8x128xf32>
    %211 = vector.shape_cast %210 : vector<1x8x128xf32> to vector<8x128xf32>
    %212 = vector.shape_cast %209 : vector<8x128xf32> to vector<1x8x128xf32>
    tpu.vector_store %arg10[%c5, %c0_67, %c0_68], %212 {strides = array<i32>} : memref<8x8x128xf32, #tpu.memory_space<vmem>>, vector<1x8x128xf32>,
    %c48 = arith.constant 48 : index
    %c0_69 = arith.constant 0 : index
    %213 = vector.load %arg9[%c48, %c0_69] : memref<64x512xf32, #tpu.memory_space<vmem>>, vector<8x512xf32>
    %214 = arith.truncf %209 : vector<8x128xf32> to vector<8x128xbf16>
    %c0_70 = arith.constant 0 : index
    %c0_71 = arith.constant 0 : index
    %215 = vector.load %arg4[%c0_70, %c0_71] : memref<128x512xbf16, #tpu.memory_space<vmem>>, vector<128x512xbf16>
    %cst_72 = arith.constant dense<0.000000e+00> : vector<8x512xf32>
    %216 = tpu.matmul %214, %215, %cst_72 {dimension_numbers = #tpu.dot_dimension_numbers<[1], [0], [0], [1], [0, 0, 1, 1], [], []>} : vector<8x128xbf16>, vector<128x512xbf16>, vector<8x512xf32> -> vector<8x512xf32>
    %217 = arith.addf %213, %216 : vector<8x512xf32>
    %218 = vector.extract_strided_slice %217 {offsets = [0, 0], sizes = [8, 128], strides = [1, 1]} : vector<8x512xf32> to vector<8x128xf32>
    %219 = arith.negf %218 : vector<8x128xf32>
    %220 = math.exp %219 : vector<8x128xf32>
    %cst_73 = arith.constant 1.000000e+00 : f32
    %221 = vector.broadcast %cst_73 : f32 to vector<8x128xf32>
    %222 = arith.addf %221, %220 : vector<8x128xf32>
    %223 = arith.divf %221, %222 : vector<8x128xf32>
    %224 = vector.extract_strided_slice %217 {offsets = [0, 128], sizes = [8, 128], strides = [1, 1]} : vector<8x512xf32> to vector<8x128xf32>
    %225 = arith.negf %224 : vector<8x128xf32>
    %226 = math.exp %225 : vector<8x128xf32>
    %cst_74 = arith.constant 1.000000e+00 : f32
    %227 = vector.broadcast %cst_74 : f32 to vector<8x128xf32>
    %228 = arith.addf %227, %226 : vector<8x128xf32>
    %229 = arith.divf %227, %228 : vector<8x128xf32>
    %230 = vector.extract_strided_slice %217 {offsets = [0, 256], sizes = [8, 128], strides = [1, 1]} : vector<8x512xf32> to vector<8x128xf32>
    %231 = math.tanh %230 : vector<8x128xf32>
    %232 = vector.extract_strided_slice %217 {offsets = [0, 384], sizes = [8, 128], strides = [1, 1]} : vector<8x512xf32> to vector<8x128xf32>
    %233 = arith.negf %232 : vector<8x128xf32>
    %234 = math.exp %233 : vector<8x128xf32>
    %cst_75 = arith.constant 1.000000e+00 : f32
    %235 = vector.broadcast %cst_75 : f32 to vector<8x128xf32>
    %236 = arith.addf %235, %234 : vector<8x128xf32>
    %237 = arith.divf %235, %236 : vector<8x128xf32>
    %238 = arith.mulf %229, %207 : vector<8x128xf32>
    %239 = arith.mulf %223, %231 : vector<8x128xf32>
    %240 = arith.addf %238, %239 : vector<8x128xf32>
    %241 = math.tanh %240 : vector<8x128xf32>
    %242 = arith.mulf %237, %241 : vector<8x128xf32>
    %c6 = arith.constant 6 : index
    %c0_76 = arith.constant 0 : index
    %c0_77 = arith.constant 0 : index
    %243 = vector.load %arg10[%c6, %c0_76, %c0_77] : memref<8x8x128xf32, #tpu.memory_space<vmem>>, vector<1x8x128xf32>
    %244 = vector.shape_cast %243 : vector<1x8x128xf32> to vector<8x128xf32>
    %245 = vector.shape_cast %242 : vector<8x128xf32> to vector<1x8x128xf32>
    tpu.vector_store %arg10[%c6, %c0_76, %c0_77], %245 {strides = array<i32>} : memref<8x8x128xf32, #tpu.memory_space<vmem>>, vector<1x8x128xf32>,
    %c56 = arith.constant 56 : index
    %c0_78 = arith.constant 0 : index
    %246 = vector.load %arg9[%c56, %c0_78] : memref<64x512xf32, #tpu.memory_space<vmem>>, vector<8x512xf32>
    %247 = arith.truncf %242 : vector<8x128xf32> to vector<8x128xbf16>
    %c0_79 = arith.constant 0 : index
    %c0_80 = arith.constant 0 : index
    %248 = vector.load %arg4[%c0_79, %c0_80] : memref<128x512xbf16, #tpu.memory_space<vmem>>, vector<128x512xbf16>
    %cst_81 = arith.constant dense<0.000000e+00> : vector<8x512xf32>
    %249 = tpu.matmul %247, %248, %cst_81 {dimension_numbers = #tpu.dot_dimension_numbers<[1], [0], [0], [1], [0, 0, 1, 1], [], []>} : vector<8x128xbf16>, vector<128x512xbf16>, vector<8x512xf32> -> vector<8x512xf32>
    %250 = arith.addf %246, %249 : vector<8x512xf32>
    %251 = vector.extract_strided_slice %250 {offsets = [0, 0], sizes = [8, 128], strides = [1, 1]} : vector<8x512xf32> to vector<8x128xf32>
    %252 = arith.negf %251 : vector<8x128xf32>
    %253 = math.exp %252 : vector<8x128xf32>
    %cst_82 = arith.constant 1.000000e+00 : f32
    %254 = vector.broadcast %cst_82 : f32 to vector<8x128xf32>
    %255 = arith.addf %254, %253 : vector<8x128xf32>
    %256 = arith.divf %254, %255 : vector<8x128xf32>
    %257 = vector.extract_strided_slice %250 {offsets = [0, 128], sizes = [8, 128], strides = [1, 1]} : vector<8x512xf32> to vector<8x128xf32>
    %258 = arith.negf %257 : vector<8x128xf32>
    %259 = math.exp %258 : vector<8x128xf32>
    %cst_83 = arith.constant 1.000000e+00 : f32
    %260 = vector.broadcast %cst_83 : f32 to vector<8x128xf32>
    %261 = arith.addf %260, %259 : vector<8x128xf32>
    %262 = arith.divf %260, %261 : vector<8x128xf32>
    %263 = vector.extract_strided_slice %250 {offsets = [0, 256], sizes = [8, 128], strides = [1, 1]} : vector<8x512xf32> to vector<8x128xf32>
    %264 = math.tanh %263 : vector<8x128xf32>
    %265 = vector.extract_strided_slice %250 {offsets = [0, 384], sizes = [8, 128], strides = [1, 1]} : vector<8x512xf32> to vector<8x128xf32>
    %266 = arith.negf %265 : vector<8x128xf32>
    %267 = math.exp %266 : vector<8x128xf32>
    %cst_84 = arith.constant 1.000000e+00 : f32
    %268 = vector.broadcast %cst_84 : f32 to vector<8x128xf32>
    %269 = arith.addf %268, %267 : vector<8x128xf32>
    %270 = arith.divf %268, %269 : vector<8x128xf32>
    %271 = arith.mulf %262, %240 : vector<8x128xf32>
    %272 = arith.mulf %256, %264 : vector<8x128xf32>
    %273 = arith.addf %271, %272 : vector<8x128xf32>
    %274 = math.tanh %273 : vector<8x128xf32>
    %275 = arith.mulf %270, %274 : vector<8x128xf32>
    %c7 = arith.constant 7 : index
    %c0_85 = arith.constant 0 : index
    %c0_86 = arith.constant 0 : index
    %276 = vector.load %arg10[%c7, %c0_85, %c0_86] : memref<8x8x128xf32, #tpu.memory_space<vmem>>, vector<1x8x128xf32>
    %277 = vector.shape_cast %276 : vector<1x8x128xf32> to vector<8x128xf32>
    %278 = vector.shape_cast %275 : vector<8x128xf32> to vector<1x8x128xf32>
    tpu.vector_store %arg10[%c7, %c0_85, %c0_86], %278 {strides = array<i32>} : memref<8x8x128xf32, #tpu.memory_space<vmem>>, vector<1x8x128xf32>,
    %c0_87 = arith.constant 0 : index
    %c0_88 = arith.constant 0 : index
    %c0_89 = arith.constant 0 : index
    %279 = vector.load %arg10[%c0_87, %c0_88, %c0_89] : memref<8x8x128xf32, #tpu.memory_space<vmem>>, vector<8x8x128xf32>
    %c0_90 = arith.constant 0 : index
    %c0_91 = arith.constant 0 : index
    %280 = vector.load %arg6[%c0_90, %c0_91] : memref<1x128xf32, #tpu.memory_space<vmem>>, vector<1x128xf32>
    %281 = vector.shape_cast %280 : vector<1x128xf32> to vector<1x1x128xf32>
    %282 = vector.broadcast %281 : vector<1x1x128xf32> to vector<8x8x128xf32>
    %283 = arith.mulf %279, %282 : vector<8x8x128xf32>
    %cst_92 = arith.constant dense<0.000000e+00> : vector<8x8xf32>
    %284 = vector.multi_reduction <add>, %283, %cst_92 [2] : vector<8x8x128xf32> to vector<8x8xf32>
    %c0_93 = arith.constant 0 : index
    %c0_94 = arith.constant 0 : index
    %285 = vector.load %arg7[%c0_93, %c0_94] : memref<1x1xf32, #tpu.memory_space<vmem>>, vector<1x1xf32>
    %286 = vector.broadcast %285 : vector<1x1xf32> to vector<8x8xf32>
    %287 = arith.addf %284, %286 : vector<8x8xf32>
    %c0_95 = arith.constant 0 : index
    %c0_96 = arith.constant 0 : index
    %288 = vector.load %arg8[%c0_95, %c0_96] : memref<8x8xf32, #tpu.memory_space<vmem>>, vector<8x8xf32>
    tpu.vector_store %arg8[%c0_95, %c0_96], %287 {strides = array<i32>} : memref<8x8xf32, #tpu.memory_space<vmem>>, vector<8x8xf32>,
    return
  }
}

</mosaic_0001>

<bundles_post_ra>
// kernel: simple_rnn_forward.1
= control target key start
LH: loop header
LB: loop body
LE: loop exit
PB: predicated region body
PF: predicated region fallthrough
CT: control target
= control target key end

     0   :  { %v4923_v1 = vmov 0   ;;  %vm3159_vm0 = vcmask 1041409   ;;  %vm3161_vm1 = vcmask 1042434   ;;  %vm3163_vm2 = vcmask 1043459   ;;  %s4913_s2 = inlined_call_operand.vmem [shape: bf16[128,512], index: 2, kind: input, shape index: {}]   ;;  %s4914_s0 = inlined_call_operand.vmem [shape: bf16[64,128], index: 0, kind: input, shape index: {}]   ;;  %s4915_s4 = inlined_call_operand.vmem [shape: bf16[128,512], index: 4, kind: input, shape index: {}]   ;;  %s4916_s1 = inlined_call_operand.vmem [shape: f32[64,1], index: 1, kind: input, shape index: {}]   ;;  %s4917_s3 = inlined_call_operand.vmem [shape: f32[1,512], index: 3, kind: input, shape index: {}]   ;;  %s4918_s5 = inlined_call_operand.vmem [shape: f32[1,512], index: 5, kind: input, shape index: {}]   ;;  %s4919_s6 = inlined_call_operand.vmem [shape: f32[1,128], index: 6, kind: input, shape index: {}]   ;;  %s4920_s7 = inlined_call_operand.<no memory space> [shape: f32[1,1], index: 7, kind: input, shape index: {}]   ;;  %s4921_s8 = inlined_call_operand.vmem [shape: f32[8,8], index: 8, kind: output, shape index: {}]  }
   0x1   :  { %v3501_v0 = vld [vmem:[%s4913_s2 + $0xe4] ss:$16 sps:$4 sm:$0xff]   ;;  %390 = vmatprep.mubr.bf16.mxu0 %v4923_v1  ;;  %463 = vmatprep.mubr.bf16.mxu1 %v4923_v1  ;;  %v3503_v2 = vld [vmem:[%s4913_s2 + $0xec] ss:$16 sps:$4 sm:$0xff]   ;;  %v3505_v3 = vld [vmem:[%s4913_s2 + $0xe0] ss:$16 sps:$4 sm:$0xff]  }
   0x2   :  { %3499 = vset.pattern.permute.xlu0 %v4923_v1  ;;  %3500 = vset.pattern.permute.xlu1 %v4923_v1  ;;  %v3506_v4 = vld [vmem:[%s4913_s2 + $0xe8] ss:$16 sps:$4 sm:$0xff]   ;;  %v3507_v5 = vld [vmem:[%s4913_s2 + $0xc4] ss:$16 sps:$4 sm:$0xff]   ;;  %v3509_v6 = vld [vmem:[%s4913_s2 + $0xcc] ss:$16 sps:$4 sm:$0xff]  }
   0x3   :  { %358 = vmatprep.subr.bf16.mxu0 %v3501_v0  ;;  %431 = vmatprep.subr.bf16.mxu1 %v3503_v2  ;;  %v3511_v7 = vld [vmem:[%s4913_s2 + $0xc0] ss:$16 sps:$4 sm:$0xff]   ;;  %v3512_v8 = vld [vmem:[%s4913_s2 + $0xc8] ss:$16 sps:$4 sm:$0xff]   ;;  %v3513_v9 = vld [vmem:[%s4913_s2 + $0xa4] ss:$16 sps:$4 sm:$0xff]  }
   0x4   :  { %359 = vmatpush1.bf16.msra.mxu0 %v3505_v3  ;;  %432 = vmatpush1.bf16.msra.mxu1 %v3506_v4  ;;  %v3515_v10 = vld [vmem:[%s4913_s2 + $0xac] ss:$16 sps:$4 sm:$0xff]   ;;  %v3517_v11 = vld [vmem:[%s4913_s2 + $0xa0] ss:$16 sps:$4 sm:$0xff]   ;;  %v3518_v12 = vld [vmem:[%s4913_s2 + $0xa8] ss:$16 sps:$4 sm:$0xff]  }
   0x5   :  { %360 = vmatprep.subr.bf16.mxu0 %v3507_v5  ;;  %433 = vmatprep.subr.bf16.mxu1 %v3509_v6  ;;  %v3519_v13 = vld [vmem:[%s4913_s2 + $0x84] ss:$16 sps:$4 sm:$0xff]   ;;  %v3521_v14 = vld [vmem:[%s4913_s2 + $0x8c] ss:$16 sps:$4 sm:$0xff]   ;;  %v3523_v15 = vld [vmem:[%s4913_s2 + $0x80] ss:$16 sps:$4 sm:$0xff]  }
   0x6   :  { %v3524_v16 = vld [vmem:[%s4913_s2 + $0x88] ss:$16 sps:$4 sm:$0xff]   ;;  %v3525_v17 = vld [vmem:[%s4913_s2 + $0x64] ss:$16 sps:$4 sm:$0xff]   ;;  %v3527_v18 = vld [vmem:[%s4913_s2 + $0x6c] ss:$16 sps:$4 sm:$0xff]  }
   0x7   :  { %v3529_v19 = vld [vmem:[%s4913_s2 + $0x60] ss:$16 sps:$4 sm:$0xff]   ;;  %v3530_v20 = vld [vmem:[%s4913_s2 + $0x68] ss:$16 sps:$4 sm:$0xff]   ;;  %v3531_v21 = vld [vmem:[%s4913_s2 + $0x44] ss:$16 sps:$4 sm:$0xff]  }
   0x8   :  { %361 = vmatpush1.bf16.msra.mxu0 %v3511_v7  ;;  %434 = vmatpush1.bf16.msra.mxu1 %v3512_v8  ;;  %v3533_v22 = vld [vmem:[%s4913_s2 + $0x4c] ss:$16 sps:$4 sm:$0xff]   ;;  %v3535_v23 = vld [vmem:[%s4913_s2 + $0x40] ss:$16 sps:$4 sm:$0xff]   ;;  %v3536_v24 = vld [vmem:[%s4913_s2 + $0x48] ss:$16 sps:$4 sm:$0xff]  }
   0x9   :  { %362 = vmatprep.subr.bf16.mxu0 %v3513_v9  ;;  %435 = vmatprep.subr.bf16.mxu1 %v3515_v10  ;;  %v3537_v25 = vld [vmem:[%s4913_s2 + $0x24] ss:$16 sps:$4 sm:$0xff]   ;;  %v3539_v26 = vld [vmem:[%s4913_s2 + $0x2c] ss:$16 sps:$4 sm:$0xff]   ;;  %v3541_v27 = vld [vmem:[%s4913_s2 + $0x20] ss:$16 sps:$4 sm:$0xff]  }
   0xa   :  { %v3542_v28 = vld [vmem:[%s4913_s2 + $0x28] ss:$16 sps:$4 sm:$0xff]   ;;  %v3543_v29 = vld [vmem:[%s4913_s2 + $0x4] ss:$16 sps:$4 sm:$0xff]   ;;  %v3545_v30 = vld [vmem:[%s4913_s2 + $0xc] ss:$16 sps:$4 sm:$0xff]  }
   0xb   :  { %v3547_v31 = vld [vmem:[%s4913_s2] ss:$16 sps:$4 sm:$0xff]   ;;  %v3548_v32 = vld [vmem:[%s4913_s2 + $0x8] ss:$16 sps:$4 sm:$0xff]   ;;  %v3975_v33 = vld [vmem:[%s4915_s4 + $0xe4] ss:$16 sps:$4 sm:$0xff]  }
   0xc   :  { %363 = vmatpush1.bf16.msra.mxu0 %v3517_v11  ;;  %436 = vmatpush1.bf16.msra.mxu1 %v3518_v12  ;;  %v3980_v34 = vld [vmem:[%s4915_s4 + $0xec] ss:$16 sps:$4 sm:$0xff]   ;;  %v3549_v35 = vld [vmem:[%s4914_s0] sm:$0xff]   ;;  %v3993_v37 = vld [vmem:[%s4915_s4 + $0xe8] ss:$16 sps:$4 sm:$0xff]   ;;  %vm3165_vm3 = vcmask 1044484  }
   0xd   :  { %364 = vmatprep.subr.bf16.mxu0 %v3519_v13  ;;  %437 = vmatprep.subr.bf16.mxu1 %v3521_v14  ;;  %v3988_v36 = vld [vmem:[%s4915_s4 + $0xe0] ss:$16 sps:$4 sm:$0xff]   ;;  %v4000_v38 = vld [vmem:[%s4915_s4 + $0xc4] ss:$16 sps:$4 sm:$0xff]   ;;  %v4005_v39 = vld [vmem:[%s4915_s4 + $0xcc] ss:$16 sps:$4 sm:$0xff]   ;;  %v4922_v14 = vlaneseq }
   0xe   :  { %v4010_v40 = vld [vmem:[%s4915_s4 + $0xc0] ss:$16 sps:$4 sm:$0xff]   ;;  %v4017_v41 = vld [vmem:[%s4915_s4 + $0xc8] ss:$16 sps:$4 sm:$0xff]   ;;  %v4024_v42 = vld [vmem:[%s4915_s4 + $0xa4] ss:$16 sps:$4 sm:$0xff]  }
   0xf   :  { %v4029_v43 = vld [vmem:[%s4915_s4 + $0xac] ss:$16 sps:$4 sm:$0xff]   ;;  %v4039_v45 = vld [vmem:[%s4915_s4 + $0xa0] ss:$16 sps:$4 sm:$0xff]   ;;  %v4044_v46 = vld [vmem:[%s4915_s4 + $0xa8] ss:$16 sps:$4 sm:$0xff]  }
  0x10   :  { %365 = vmatpush1.bf16.msra.mxu0 %v3523_v15  ;;  %438 = vmatpush1.bf16.msra.mxu1 %v3524_v16  ;;  %v3562_v44 = vld [vmem:[%s4914_s0 + $0x8] sm:$0xff]   ;;  %v4051_v47 = vld [vmem:[%s4915_s4 + $0x84] ss:$16 sps:$4 sm:$0xff]   ;;  %v4063_v49 = vld [vmem:[%s4915_s4 + $0x80] ss:$16 sps:$4 sm:$0xff]   ;;  %v4247_v15 = vshrl.u32 %v4922_v14, 7 }
  0x11   :  { %366 = vmatprep.subr.bf16.mxu0 %v3525_v17  ;;  %439 = vmatprep.subr.bf16.mxu1 %v3527_v18  ;;  %v4058_v48 = vld [vmem:[%s4915_s4 + $0x8c] ss:$16 sps:$4 sm:$0xff]   ;;  %v4068_v50 = vld [vmem:[%s4915_s4 + $0x88] ss:$16 sps:$4 sm:$0xff]   ;;  %v4075_v51 = vld [vmem:[%s4915_s4 + $0x64] ss:$16 sps:$4 sm:$0xff]  }
  0x12   :  { %v4082_v52 = vld [vmem:[%s4915_s4 + $0x6c] ss:$16 sps:$4 sm:$0xff]   ;;  %v72_v53 = vld [vmem:[%s4916_s1] sm:$0xff]  ;;  %v3575_v54 = vld [vmem:[%s4914_s0 + $0x10] sm:$0xff]   ;;  %4934 = vst [vmem:[#allocation9_spill] sm:$0xff] %v4247_v15  ;;  %v132_v17 = vsub.s32 2, %v4247_v15 }
  0x13   :  { %83 = vperm.xlu0 %3499, %v72_v53   ;;  %v74_v55 = vld [vmem:[%s4916_s1 + $0x10] sm:$0xff]  ;;  %v4105_v57 = vld [vmem:[%s4915_s4 + $0x68] ss:$16 sps:$4 sm:$0xff]   ;;  %v4117_v59 = vld [vmem:[%s4915_s4 + $0x4c] ss:$16 sps:$4 sm:$0xff]   ;;  %v124_v18 = vsub.s32 0, %v4247_v15 }
  0x14   :  { %367 = vmatpush1.bf16.msra.mxu0 %v3529_v19  ;;  %440 = vmatpush1.bf16.msra.mxu1 %v3530_v20  ;;  %v4100_v56 = vld [vmem:[%s4915_s4 + $0x60] ss:$16 sps:$4 sm:$0xff]   ;;  %v4112_v58 = vld [vmem:[%s4915_s4 + $0x44] ss:$16 sps:$4 sm:$0xff]   ;;  %v4127_v61 = vld [vmem:[%s4915_s4 + $0x48] ss:$16 sps:$4 sm:$0xff]  }
  0x15   :  { %368 = vmatprep.subr.bf16.mxu0 %v3531_v21  ;;  %441 = vmatprep.subr.bf16.mxu1 %v3533_v22  ;;  %v4122_v60 = vld [vmem:[%s4915_s4 + $0x40] ss:$16 sps:$4 sm:$0xff]   ;;  %v73_v62 = vld [vmem:[%s4916_s1 + $0x8] sm:$0xff]  ;;  %v75_v63 = vld [vmem:[%s4916_s1 + $0x18] sm:$0xff]  ;;  %v136_v19 = vsub.s32 3, %v4247_v15  ;;  %v128_v22 = vsub.s32 1, %v4247_v15 }
  0x16   :  { %93 = vperm.xlu1 %3500, %v74_v55   ;;  %v4138_v0 = vld [vmem:[%s4915_s4 + $0x24] ss:$16 sps:$4 sm:$0xff]   ;;  %v4143_v2 = vld [vmem:[%s4915_s4 + $0x2c] ss:$16 sps:$4 sm:$0xff]   ;;  %v4157_v4 = vld [vmem:[%s4915_s4 + $0x20] ss:$16 sps:$4 sm:$0xff]  }
  0x17   :  { %v3588_v3 = vld [vmem:[%s4914_s0 + $0x18] sm:$0xff]   ;;  %v4167_v6 = vld [vmem:[%s4915_s4 + $0x4] ss:$16 sps:$4 sm:$0xff]   ;;  %88 = vperm.xlu0 %3499, %v73_v62   ;;  %v4181_v8 = vld [vmem:[%s4915_s4] ss:$16 sps:$4 sm:$0xff]   ;;  %vm3167_vm4 = vcmask 1045509  }
  0x18   :  { %369 = vmatpush1.bf16.msra.mxu0 %v3535_v23  ;;  %442 = vmatpush1.bf16.msra.mxu1 %v3536_v24  ;;  %v4162_v5 = vld [vmem:[%s4915_s4 + $0x28] ss:$16 sps:$4 sm:$0xff]   ;;  %4930 = vst [vmem:[#allocation5_spill] sm:$0xff] %v4167_v6  ;;  %v4172_v7 = vld [vmem:[%s4915_s4 + $0xc] ss:$16 sps:$4 sm:$0xff]   ;;  %4932 = vst [vmem:[#allocation7_spill] sm:$0xff] %v4181_v8 }
  0x19   :  { %370 = vmatprep.subr.bf16.mxu0 %v3537_v25  ;;  %443 = vmatprep.subr.bf16.mxu1 %v3539_v26  ;;  %4931 = vst [vmem:[#allocation6_spill] sm:$0xff] %v4172_v7  ;;  %v4186_v9 = vld [vmem:[%s4915_s4 + $0x8] ss:$16 sps:$4 sm:$0xff]   ;;  %v76_v10 = vld [vmem:[%s4916_s1 + $0x20] sm:$0xff]  ;;  %v78_v12 = vld [vmem:[%s4916_s1 + $0x30] sm:$0xff]  ;;  %vm3169_vm5 = vcmask 1046534  }
  0x1a   :  { %98 = vperm.xlu1 %3500, %v75_v63   ;;  %4933 = vst [vmem:[#allocation8_spill] sm:$0xff] %v4186_v9  ;;  %v77_v11 = vld [vmem:[%s4916_s1 + $0x28] sm:$0xff]  ;;  %v79_v13 = vld [vmem:[%s4916_s1 + $0x38] sm:$0xff]  ;;  %v80_v20 = vld [vmem:[%s4917_s3] sm:$0xf]  ;;  %vm3171_vm6 = vcmask 1047559  }
  0x1b   :  { %103 = vperm.xlu0 %3499, %v76_v10   ;;  %v4257_v21 = vrot.slane %v80_v20, %v132_v17  ;;  %v4260_v24 = vrot.slane %v80_v20, %v124_v18  ;;  %v4262_v25 = vrot.slane %v80_v20, %v136_v19  ;;  %vm3174_vm7 = vcmask 64512  }
  0x1c   :  { %371 = vmatpush1.bf16.msra.mxu0 %v3541_v27  ;;  %444 = vmatpush1.bf16.msra.mxu1 %v3542_v28 }
  0x1d   :  { %372 = vmatprep.subr.bf16.mxu0 %v3543_v29  ;;  %445 = vmatprep.subr.bf16.mxu1 %v3545_v30  ;;  %v4268_v29 = vrot.slane %v80_v20, %v128_v22 }
  0x1e   :  { %108 = vperm.xlu1 %3500, %v77_v11  }
  0x1f   :  { %113 = vperm.xlu0 %3499, %v78_v12  }
  0x20   :  { %373 = vmatpush1.bf16.msra.mxu0 %v3547_v31  ;;  %446 = vmatpush1.bf16.msra.mxu1 %v3548_v32  ;;  %v504_v32 = vld [vmem:[%s4918_s5] sm:$0xf] }
  0x21   :  { %786 = vmatprep.subr.bf16.mxu0 %v3975_v33  ;;  %827 = vmatprep.subr.bf16.mxu1 %v3980_v34  ;;  %v4281_v53 = vrot.slane %v504_v32, %v132_v17  ;;  %v4283_v62 = vrot.slane %v504_v32, %v124_v18  ;;  %v4285_v63 = vrot.slane %v504_v32, %v136_v19 }
  0x22   :  { %118 = vperm.xlu1 %3500, %v79_v13  }
  0x23   :  { %391 = vmatmul.mubr.bf16.vlgmr.msra.gmra.mxu0 %v3549_v35  ;;  %464 = vmatmul.mubr.bf16.vlgmr.msra.gmra.mxu1 %v3549_v35 }
  0x24   :  { %787 = vmatpush1.bf16.msra.mxu0 %v3988_v36  ;;  %828 = vmatpush1.bf16.msra.mxu1 %v3993_v37 }
  0x25   :  { %788 = vmatprep.subr.bf16.mxu0 %v4000_v38  ;;  %829 = vmatprep.subr.bf16.mxu1 %v4005_v39 }
  0x26   :  { %400 = vmatprep.mubr.bf16.mxu0 %v4923_v1  ;;  %473 = vmatprep.mubr.bf16.mxu1 %v4923_v1 }
  0x28   :  { %789 = vmatpush1.bf16.msra.mxu0 %v4010_v40  ;;  %830 = vmatpush1.bf16.msra.mxu1 %v4017_v41 }
  0x29   :  { %790 = vmatprep.subr.bf16.mxu0 %v4024_v42  ;;  %831 = vmatprep.subr.bf16.mxu1 %v4029_v43 }
  0x2b   :  { %401 = vmatmul.mubr.bf16.gmra.mxu0 %v3562_v44  ;;  %474 = vmatmul.mubr.bf16.gmra.mxu1 %v3562_v44 }
  0x2c   :  { %791 = vmatpush1.bf16.msra.mxu0 %v4039_v45  ;;  %832 = vmatpush1.bf16.msra.mxu1 %v4044_v46 }
  0x2d   :  { %792 = vmatprep.subr.bf16.mxu0 %v4051_v47  ;;  %833 = vmatprep.subr.bf16.mxu1 %v4058_v48 }
  0x2e   :  { %410 = vmatprep.mubr.bf16.mxu0 %v4923_v1  ;;  %483 = vmatprep.mubr.bf16.mxu1 %v4923_v1 }
  0x30   :  { %793 = vmatpush1.bf16.msra.mxu0 %v4063_v49  ;;  %834 = vmatpush1.bf16.msra.mxu1 %v4068_v50 }
  0x31   :  { %794 = vmatprep.subr.bf16.mxu0 %v4075_v51  ;;  %835 = vmatprep.subr.bf16.mxu1 %v4082_v52 }
  0x33   :  { %411 = vmatmul.mubr.bf16.gmra.mxu0 %v3575_v54  ;;  %484 = vmatmul.mubr.bf16.gmra.mxu1 %v3575_v54 }
  0x34   :  { %795 = vmatpush1.bf16.msra.mxu0 %v4100_v56  ;;  %836 = vmatpush1.bf16.msra.mxu1 %v4105_v57 }
  0x35   :  { %796 = vmatprep.subr.bf16.mxu0 %v4112_v58  ;;  %837 = vmatprep.subr.bf16.mxu1 %v4117_v59 }
  0x36   :  { %420 = vmatprep.mubr.bf16.mxu0 %v4923_v1  ;;  %493 = vmatprep.mubr.bf16.mxu1 %v4923_v1 }
  0x38   :  { %797 = vmatpush1.bf16.msra.mxu0 %v4122_v60  ;;  %838 = vmatpush1.bf16.msra.mxu1 %v4127_v61 }
  0x39   :  { %798 = vmatprep.subr.bf16.mxu0 %v4138_v0  ;;  %839 = vmatprep.subr.bf16.mxu1 %v4143_v2 }
  0x3b   :  { %421 = vmatmul.mubr.bf16.gmra.mxu0 %v3588_v3  ;;  %494 = vmatmul.mubr.bf16.gmra.mxu1 %v3588_v3 }
  0x3c   :  { %799 = vmatpush1.bf16.msra.mxu0 %v4157_v4  ;;  %840 = vmatpush1.bf16.msra.mxu1 %v4162_v5 }
  0x3d   :  { %800 = vmatprep.subr.bf16.mxu0 %v4167_v6  ;;  %841 = vmatprep.subr.bf16.mxu1 %v4172_v7 }
  0x3e   :  { %818 = vmatprep.mubr.bf16.mxu0 %v4923_v1  ;;  %859 = vmatprep.mubr.bf16.mxu1 %v4923_v1 }
  0x40   :  { %801 = vmatpush1.bf16.msra.mxu0 %v4181_v8  ;;  %842 = vmatpush1.bf16.msra.mxu1 %v4186_v9 }
  0x41   :  { %1094 = vmatprep.subr.bf16.mxu0 %v3975_v33  ;;  %1135 = vmatprep.subr.bf16.mxu1 %v3980_v34 }
  0x43   :  { %819 = vmatmul.mubr.bf16.vlgmr.msra.gmra.mxu0 %v4923_v1  ;;  %860 = vmatmul.mubr.bf16.vlgmr.msra.gmra.mxu1 %v4923_v1 }
  0x44   :  { %1095 = vmatpush1.bf16.msra.mxu0 %v3988_v36  ;;  %1136 = vmatpush1.bf16.msra.mxu1 %v3993_v37 }
  0x45   :  { %1096 = vmatprep.subr.bf16.mxu0 %v4000_v38  ;;  %1137 = vmatprep.subr.bf16.mxu1 %v4005_v39 }
  0x46   :  { %1126 = vmatprep.mubr.bf16.mxu0 %v4923_v1  ;;  %1167 = vmatprep.mubr.bf16.mxu1 %v4923_v1 }
  0x48   :  { %1097 = vmatpush1.bf16.msra.mxu0 %v4010_v40  ;;  %1138 = vmatpush1.bf16.msra.mxu1 %v4017_v41 }
  0x49   :  { %1098 = vmatprep.subr.bf16.mxu0 %v4024_v42  ;;  %1139 = vmatprep.subr.bf16.mxu1 %v4029_v43 }
  0x4c   :  { %1099 = vmatpush1.bf16.msra.mxu0 %v4039_v45  ;;  %1140 = vmatpush1.bf16.msra.mxu1 %v4044_v46 }
  0x4d   :  { %1100 = vmatprep.subr.bf16.mxu0 %v4051_v47  ;;  %1141 = vmatprep.subr.bf16.mxu1 %v4058_v48 }
  0x50   :  { %1101 = vmatpush1.bf16.msra.mxu0 %v4063_v49  ;;  %1142 = vmatpush1.bf16.msra.mxu1 %v4068_v50 }
  0x51   :  { %1102 = vmatprep.subr.bf16.mxu0 %v4075_v51  ;;  %1143 = vmatprep.subr.bf16.mxu1 %v4082_v52 }
  0x54   :  { %1103 = vmatpush1.bf16.msra.mxu0 %v4100_v56  ;;  %1144 = vmatpush1.bf16.msra.mxu1 %v4105_v57 }
  0x55   :  { %1104 = vmatprep.subr.bf16.mxu0 %v4112_v58  ;;  %1145 = vmatprep.subr.bf16.mxu1 %v4117_v59 }
  0x58   :  { %1105 = vmatpush1.bf16.msra.mxu0 %v4122_v60  ;;  %1146 = vmatpush1.bf16.msra.mxu1 %v4127_v61 }
  0x59   :  { %1106 = vmatprep.subr.bf16.mxu0 %v4138_v0  ;;  %1147 = vmatprep.subr.bf16.mxu1 %v4143_v2 }
  0x5c   :  { %1107 = vmatpush1.bf16.msra.mxu0 %v4157_v4  ;;  %1148 = vmatpush1.bf16.msra.mxu1 %v4162_v5 }
  0x5d   :  { %1108 = vmatprep.subr.bf16.mxu0 %v4167_v6  ;;  %1149 = vmatprep.subr.bf16.mxu1 %v4172_v7 }
  0x60   :  { %1109 = vmatpush1.bf16.msra.mxu0 %v4181_v8  ;;  %1150 = vmatpush1.bf16.msra.mxu1 %v4186_v9 }
  0x61   :  { %1403 = vmatprep.subr.bf16.mxu0 %v3975_v33  ;;  %1444 = vmatprep.subr.bf16.mxu1 %v3980_v34 }
  0x8e   :  { %v4249_v16 = vpop.permute.xlu0 %83 }
  0x91   :  { %v94_v26 = vpop.permute.xlu1 %93 }
  0x92   :  { %v89_v23 = vpop.permute.xlu0 %88  ;;  %v150_v11 = vmul.f32 %v4260_v24, %v94_v26  ;;  %v152_v12 = vmul.f32 %v4257_v21, %v94_v26  ;;  %v151_v1 = vmul.f32 %v4268_v29, %v94_v26  ;;  %v153_v17 = vmul.f32 %v4262_v25, %v94_v26 }
  0x93   :  { %v146_v30 = vmul.f32 %v4260_v24, %v89_v23  ;;  %v148_v31 = vmul.f32 %v4257_v21, %v89_v23  ;;  %v147_v35 = vmul.f32 %v4268_v29, %v89_v23  ;;  %v149_v44 = vmul.f32 %v4262_v25, %v89_v23 }
  0x94   :  { %v4291_v23 = vrot.slane %v504_v32, %v128_v22 }
  0x95   :  { %v99_v13 = vpop.permute.xlu1 %98 }
  0x96   :  { %v156_v9 = vmul.f32 %v4257_v21, %v99_v13  ;;  %v104_v6 = vpop.permute.xlu0 %103 }
  0xe3   :  { %v4264_v27 = vpop.f32.mrf.mxu0  ;;  %v4266_v28 = vpop.f32.mrf.mxu1 }
  0xe5   :  { %v4275_v33 = vpop.f32.mrf.mxu0  ;;  %v4277_v34 = vpop.f32.mrf.mxu1 }
  0xe7   :  { %v396_v54 = vpop.f32.mrf.mxu0  ;;  %v469_v55 = vpop.f32.mrf.mxu1 }
  0xe8   :  { %v397_v3 = vadd.f32 %v396_v54, %v146_v30  ;;  %v470_v10 = vadd.f32 %v469_v55, %v148_v31  ;;  %v154_v55 = vmul.f32 %v4260_v24, %v99_v13 }
  0xe9   :  { %v398_v20 = vpop.f32.mrf.mxu0  ;;  %v471_v14 = vpop.f32.mrf.mxu1 }
  0xea   :  { %v399_v15 = vadd.f32 %v398_v20, %v147_v35  ;;  %v472_v18 = vadd.f32 %v471_v14, %v149_v44  ;;  %v4294_v19 = vadd.f32 %v4283_v62, %v397_v3  ;;  %v4297_v30 = vadd.f32 %v4281_v53, %v470_v10 }
  0xeb   :  { %v402_v31 = vpop.f32.mrf.mxu0  ;;  %v475_v54 = vpop.f32.mrf.mxu1  ;;  %v155_v35 = vmul.f32 %v4268_v29, %v99_v13  ;;  %v157_v44 = vmul.f32 %v4262_v25, %v99_v13 }
  0xec   :  { %4935 = vst [vmem:[#allocation10_spill] sm:$0xff] %v4297_v30  ;;  %v403_v8 = vadd.f32 %v402_v31, %v150_v11  ;;  %v476_v7 = vadd.f32 %v475_v54, %v152_v12  ;;  %v4302_v22 = vadd.f32 %v4291_v23, %v399_v15  ;;  %v4305_v14 = vadd.f32 %v4285_v63, %v472_v18 }
  0xed   :  { %v404_v26 = vpop.f32.mrf.mxu0  ;;  %v477_v32 = vpop.f32.mrf.mxu1  ;;  %v158_v31 = vmul.f32 %v4260_v24, %v104_v6  ;;  %v160_v18 = vmul.f32 %v4257_v21, %v104_v6 }
  0xee   :  { %4936 = vst [vmem:[#allocation11_spill] sm:$0xff] %v4302_v22  ;;  %4937 = vst [vmem:[#allocation12_spill] sm:$0xff] %v4305_v14  ;;  %v405_v3 = vadd.f32 %v404_v26, %v151_v1  ;;  %v478_v10 = vadd.f32 %v477_v32, %v153_v17  ;;  %v4310_v20 = vadd.f32 %v4283_v62, %v403_v8  ;;  %v109_v14 = vpop.permute.xlu1 %108 }
  0xef   :  { %v4313_v11 = vadd.f32 %v4281_v53, %v476_v7  ;;  %v406_v12 = vpop.f32.mrf.mxu0  ;;  %v479_v15 = vpop.f32.mrf.mxu1  ;;  %v159_v7 = vmul.f32 %v4268_v29, %v104_v6  ;;  %v161_v17 = vmul.f32 %v4262_v25, %v104_v6 }
  0xf0   :  { %4938 = vst [vmem:[#allocation13_spill] sm:$0xff] %v4310_v20  ;;  %v407_v54 = vadd.f32 %v406_v12, %v154_v55  ;;  %v480_v30 = vadd.f32 %v479_v15, %v156_v9  ;;  %v4318_v22 = vadd.f32 %v4291_v23, %v405_v3  ;;  %v4321_v1 = vadd.f32 %v4285_v63, %v478_v10 }
  0xf1   :  { %4939 = vst [vmem:[#allocation14_spill] sm:$0xff] %v4313_v11  ;;  %v408_v8 = vpop.f32.mrf.mxu0  ;;  %v481_v13 = vpop.f32.mrf.mxu1  ;;  %v162_v12 = vmul.f32 %v4260_v24, %v109_v14  ;;  %v164_v10 = vmul.f32 %v4257_v21, %v109_v14 }
  0xf2   :  { %4940 = vst [vmem:[#allocation15_spill] sm:$0xff] %v4318_v22  ;;  %4941 = vst [vmem:[#allocation16_spill] sm:$0xff] %v4321_v1  ;;  %v409_v26 = vadd.f32 %v408_v8, %v155_v35  ;;  %v482_v32 = vadd.f32 %v481_v13, %v157_v44  ;;  %v4326_v11 = vadd.f32 %v4283_v62, %v407_v54  ;;  %v114_v22 = vpop.permute.xlu0 %113 }
  0xf3   :  { %v4329_v9 = vadd.f32 %v4281_v53, %v480_v30  ;;  %v412_v55 = vpop.f32.mrf.mxu0  ;;  %v485_v3 = vpop.f32.mrf.mxu1  ;;  %v163_v30 = vmul.f32 %v4268_v29, %v109_v14  ;;  %v165_v54 = vmul.f32 %v4262_v25, %v109_v14 }
  0xf4   :  { %4942 = vst [vmem:[#allocation17_spill] sm:$0xff] %v4326_v11  ;;  %v413_v15 = vadd.f32 %v412_v55, %v158_v31  ;;  %v486_v1 = vadd.f32 %v485_v3, %v160_v18  ;;  %v4334_v20 = vadd.f32 %v4291_v23, %v409_v26  ;;  %v4337_v6 = vadd.f32 %v4285_v63, %v482_v32 }
  0xf5   :  { %4943 = vst [vmem:[#allocation18_spill] sm:$0xff] %v4329_v9  ;;  %v414_v35 = vpop.f32.mrf.mxu0  ;;  %v487_v44 = vpop.f32.mrf.mxu1  ;;  %v166_v55 = vmul.f32 %v4260_v24, %v114_v22  ;;  %v168_v32 = vmul.f32 %v4257_v21, %v114_v22 }
  0xf6   :  { %4944 = vst [vmem:[#allocation19_spill] sm:$0xff] %v4334_v20  ;;  %4945 = vst [vmem:[#allocation20_spill] sm:$0xff] %v4337_v6  ;;  %v415_v8 = vadd.f32 %v414_v35, %v159_v7  ;;  %v488_v13 = vadd.f32 %v487_v44, %v161_v17  ;;  %v4342_v9 = vadd.f32 %v4283_v62, %v413_v15  ;;  %v119_v20 = vpop.permute.xlu1 %118 }
  0xf7   :  { %v4345_v31 = vadd.f32 %v4281_v53, %v486_v1  ;;  %v416_v18 = vpop.f32.mrf.mxu0  ;;  %v489_v26 = vpop.f32.mrf.mxu1  ;;  %v142_v7 = vmul.f32 %v4260_v24, %v4249_v16  ;;  %v167_v15 = vmul.f32 %v4268_v29, %v114_v22  ;;  %v169_v35 = vmul.f32 %v4262_v25, %v114_v22 }
  0xf8   :  { %4946 = vst [vmem:[#allocation21_spill] sm:$0xff] %v4342_v9  ;;  %v417_v3 = vadd.f32 %v416_v18, %v162_v12  ;;  %v490_v6 = vadd.f32 %v489_v26, %v164_v10  ;;  %v4350_v11 = vadd.f32 %v4291_v23, %v415_v8  ;;  %v4353_v14 = vadd.f32 %v4285_v63, %v488_v13 }
  0xf9   :  { %4947 = vst [vmem:[#allocation22_spill] sm:$0xff] %v4345_v31  ;;  %v418_v1 = vpop.f32.mrf.mxu0  ;;  %v491_v17 = vpop.f32.mrf.mxu1  ;;  %v143_v8 = vmul.f32 %v4268_v29, %v4249_v16  ;;  %v170_v26 = vmul.f32 %v4260_v24, %v119_v20 }
  0xfa   :  { %4948 = vst [vmem:[#allocation23_spill] sm:$0xff] %v4350_v11  ;;  %4949 = vst [vmem:[#allocation24_spill] sm:$0xff] %v4353_v14  ;;  %v419_v44 = vadd.f32 %v418_v1, %v163_v30  ;;  %v492_v31 = vadd.f32 %v491_v17, %v165_v54  ;;  %v4360_v12 = vadd.f32 %v4283_v62, %v417_v3 }
  0xfb   :  { %v4363_v10 = vadd.f32 %v4281_v53, %v490_v6  ;;  %v422_v13 = vpop.f32.mrf.mxu0  ;;  %v495_v18 = vpop.f32.mrf.mxu1  ;;  %v172_v14 = vmul.f32 %v4257_v21, %v119_v20  ;;  %v393_v6 = vadd.f32 %v4264_v27, %v142_v7  ;;  %v171_v1 = vmul.f32 %v4268_v29, %v119_v20 }
  0xfc   :  { %4950 = vst [vmem:[#allocation25_spill] sm:$0xff] %v4360_v12  ;;  %v423_v11 = vadd.f32 %v422_v13, %v166_v55  ;;  %v496_v9 = vadd.f32 %v495_v18, %v168_v32  ;;  %v4370_v22 = vadd.f32 %v4291_v23, %v419_v44  ;;  %v4373_v30 = vadd.f32 %v4285_v63, %v492_v31 }
  0xfd   :  { %4951 = vst [vmem:[#allocation26_spill] sm:$0xff] %v4363_v10  ;;  %v424_v54 = vpop.f32.mrf.mxu0  ;;  %v497_v3 = vpop.f32.mrf.mxu1  ;;  %v173_v17 = vmul.f32 %v4262_v25, %v119_v20  ;;  %v395_v32 = vadd.f32 %v4275_v33, %v143_v8 }
  0xfe   :  { %v425_v10 = vadd.f32 %v424_v54, %v167_v15  ;;  %v498_v24 = vadd.f32 %v497_v3, %v169_v35  ;;  %v4379_v12 = vadd.f32 %v4283_v62, %v423_v11  ;;  %v4382_v55 = vadd.f32 %v4281_v53, %v496_v9 }
  0xff   :  { %v426_v31 = vpop.f32.mrf.mxu0  ;;  %v499_v44 = vpop.f32.mrf.mxu1  ;;  %v526_v11 = vadd.f32 %v4283_v62, %v393_v6  ;;  %v145_v6 = vmul.f32 %v4262_v25, %v4249_v16 }
 0x100   :  { %v427_v13 = vadd.f32 %v426_v31, %v170_v26  ;;  %v500_v27 = vadd.f32 %v499_v44, %v172_v14  ;;  %v4386_v7 = vadd.f32 %v4291_v23, %v425_v10  ;;  %v4389_v29 = vadd.f32 %v4285_v63, %v498_v24 }
 0x101   :  { %v428_v20 = vpop.f32.mrf.mxu0  ;;  %v501_v15 = vpop.f32.mrf.mxu1  ;;  %v527_v10 = vadd.f32 %v4291_v23, %v395_v32 }
 0x102   :  { %v429_v35 = vadd.f32 %v428_v20, %v171_v1  ;;  %v502_v18 = vadd.f32 %v501_v15, %v173_v17  ;;  %v4393_v9 = vadd.f32 %v4283_v62, %v427_v13  ;;  %v4396_v33 = vadd.f32 %v4281_v53, %v500_v27 }
 0x103   :  { %v820_v8 = vpop.f32.mrf.mxu0  ;;  %v861_v14 = vpop.f32.mrf.mxu1  ;;  %v468_v27 = vadd.f32 %v4277_v34, %v145_v6 }
 0x104   :  { %4952 = vst [vmem:[#allocation27_spill] sm:$0xff] %v4396_v33  ;;  %v868_v26 = vadd.f32 %v820_v8, %v526_v11  ;;  %v4400_v54 = vadd.f32 %v4291_v23, %v429_v35  ;;  %v4403_v3 = vadd.f32 %v4285_v63, %v502_v18  ;;  %v144_v23 = vmul.f32 %v4257_v21, %v4249_v16 }
 0x105   :  { %v822_v1 = vpop.f32.mrf.mxu0  ;;  %v863_v62 = vpop.f32.mrf.mxu1  ;;  %v529_v15 = vadd.f32 %v4285_v63, %v468_v27 }
 0x106   :  { %v3248_v17 = vmul.f32 -1.442695, %v868_v26  ;;  %v869_v24 = vadd.f32 %v822_v1, %v527_v10  ;;  %v466_v25 = vadd.f32 %v4266_v28, %v144_v23 }
 0x107   :  { %v824_v31 = vpop.f32.mrf.mxu0  ;;  %v865_v44 = vpop.f32.mrf.mxu1  ;;  %v871_v11 = vadd.f32 %v863_v62, %v529_v15 }
 0x108   :  { %3697 = vpow2.f32 %v3248_v17  ;;  %v3249_v13 = vmul.f32 -1.442695, %v869_v24  ;;  %v528_v35 = vadd.f32 %v4281_v53, %v466_v25  ;;  %v4419_v31 = vld [vmem:[%s4919_s6] ss:$0 sm:$0xff] }
 0x109   :  { %v825_v32 = vpop.f32.mrf.mxu0  ;;  %v866_v20 = vpop.f32.mrf.mxu1  ;;  %v3250_v18 = vmul.f32 -1.442695, %v871_v11 }
 0x10a   :  { %3699 = vpow2.f32 %v3249_v13  ;;  %v870_v26 = vadd.f32 %v861_v14, %v528_v35  ;;  %v4953_v32 = vmov 0  }
 0x10b   :  { %3701 = vpow2.f32 %v3250_v18 }
 0x115   :  { %v3698_v8 = vpop.eup %3697 }
 0x116   :  { %v875_v10 = vadd.f32 1.0, %v3698_v8 }
 0x117   :  { %v3700_v1 = vpop.eup %3699 }
 0x118   :  { %3703 = vrcp.f32 %v875_v10  ;;  %v881_v34 = vadd.f32 1.0, %v3700_v1  ;;  %v3702_v6 = vpop.eup %3701 }
 0x119   :  { %3705 = vtanh.f32 %v870_v26  ;;  %v888_v63 = vadd.f32 1.0, %v3702_v6  ;;  %v4468_v6 = vld [vmem:[%s4915_s4 + $0xe4] ss:$16 sps:$4 sm:$0xff]  }
 0x11a   :  { %3707 = vrcp.f32 %v881_v34 }
 0x11b   :  { %3709 = vrcp.f32 %v888_v63  ;;  %v4492_v63 = vld [vmem:[%s4915_s4 + $0xc4] ss:$16 sps:$4 sm:$0xff]  }
 0x125   :  { %v3704_v17 = vpop.eup %3703 }
 0x126   :  { %v3706_v16 = vpop.eup %3705 }
 0x127   :  { %v3708_v21 = vpop.eup %3707  ;;  %v892_v28 = vmul.f32 %v3706_v16, %v3704_v17  ;;  %v4473_v17 = vld [vmem:[%s4915_s4 + $0xec] ss:$16 sps:$4 sm:$0xff]   ;;  %v4478_v16 = vld [vmem:[%s4915_s4 + $0xe0] ss:$16 sps:$4 sm:$0xff]  }
 0x128   :  { %v891_v24 = vmul.f32 0.0, %v3708_v21  ;;  %v3710_v53 = vpop.eup %3709  ;;  %v4483_v21 = vld [vmem:[%s4915_s4 + $0xe8] ss:$16 sps:$4 sm:$0xff]  }
 0x12a   :  { %v4413_v62 = vadd.f32 %v892_v28, %v891_v24  ;;  %v4497_v24 = vld [vmem:[%s4915_s4 + $0xcc] ss:$16 sps:$4 sm:$0xff]   ;;  %v4502_v28 = vld [vmem:[%s4915_s4 + $0xc0] ss:$16 sps:$4 sm:$0xff]  }
 0x12c   :  { %3711 = vtanh.f32 %v4413_v62 }
 0x139   :  { %v3712_v14 = vpop.eup %3711 }
 0x13a   :  { %v895_v44 = vmul.f32 %v3712_v14, %v3710_v53  ;;  %v4516_v53 = vld [vmem:[%s4915_s4 + $0xa4] ss:$16 sps:$4 sm:$0xff]   ;;  %v4521_v14 = vld [vmem:[%s4915_s4 + $0xac] ss:$16 sps:$4 sm:$0xff]  }
 0x13c   :  { %v3075_v13 = vmul.f32 %v4419_v31, %v895_v44  ;;  %v901_v27 = vpack.c.bf16 %v895_v44, %v895_v44  ;;  %v4526_v44 = vld [vmem:[%s4915_s4 + $0xa0] ss:$16 sps:$4 sm:$0xff]  }
 0x13e   :  { %3083 = vadd.xlane.f32.xlu0 %v3075_v13  ;;  %1127 = vmatmul.mubr.bf16.vlgmr.msra.gmra.mxu0 %v901_v27  ;;  %v4531_v13 = vld [vmem:[%s4915_s4 + $0xa8] ss:$16 sps:$4 sm:$0xff]  }
 0x13f   :  { %1168 = vmatmul.mubr.bf16.vlgmr.msra.gmra.mxu1 %v901_v27  ;;  %1404 = vmatpush1.bf16.msra.mxu0 %v3988_v36  ;;  %v4954_v36 = vld [vmem:[#allocation5_spill] sm:$0xff] }
 0x140   :  { %1445 = vmatpush1.bf16.msra.mxu1 %v3993_v37  ;;  %1405 = vmatprep.subr.bf16.mxu0 %v4000_v38  ;;  %v4955_v37 = vld [vmem:[#allocation6_spill] sm:$0xff]  ;;  %v4956_v38 = vld [vmem:[#allocation7_spill] sm:$0xff] }
 0x141   :  { %1446 = vmatprep.subr.bf16.mxu1 %v4005_v39  ;;  %1435 = vmatprep.mubr.bf16.mxu0 %v4953_v32  ;;  %v4957_v39 = vld [vmem:[#allocation8_spill] sm:$0xff] }
 0x142   :  { %1476 = vmatprep.mubr.bf16.mxu1 %v4953_v32  ;;  %v4540_v27 = vld [vmem:[%s4915_s4 + $0x80] ss:$16 sps:$4 sm:$0xff]  }
 0x143   :  { %1406 = vmatpush1.bf16.msra.mxu0 %v4010_v40 }
 0x144   :  { %1447 = vmatpush1.bf16.msra.mxu1 %v4017_v41  ;;  %1407 = vmatprep.subr.bf16.mxu0 %v4024_v42 }
 0x145   :  { %1448 = vmatprep.subr.bf16.mxu1 %v4029_v43 }
 0x147   :  { %1408 = vmatpush1.bf16.msra.mxu0 %v4039_v45 }
 0x148   :  { %1449 = vmatpush1.bf16.msra.mxu1 %v4044_v46  ;;  %1409 = vmatprep.subr.bf16.mxu0 %v4051_v47  ;;  %v4958_v46 = vld [vmem:[#allocation11_spill] sm:$0xff] }
 0x149   :  { %1450 = vmatprep.subr.bf16.mxu1 %v4058_v48 }
 0x14b   :  { %1410 = vmatpush1.bf16.msra.mxu0 %v4063_v49 }
 0x14c   :  { %1451 = vmatpush1.bf16.msra.mxu1 %v4068_v50  ;;  %1411 = vmatprep.subr.bf16.mxu0 %v4075_v51 }
 0x14d   :  { %1452 = vmatprep.subr.bf16.mxu1 %v4082_v52 }
 0x14f   :  { %1412 = vmatpush1.bf16.msra.mxu0 %v4100_v56 }
 0x150   :  { %1453 = vmatpush1.bf16.msra.mxu1 %v4105_v57  ;;  %1413 = vmatprep.subr.bf16.mxu0 %v4112_v58  ;;  %v4959_v57 = vld [vmem:[#allocation12_spill] sm:$0xff] }
 0x151   :  { %1454 = vmatprep.subr.bf16.mxu1 %v4117_v59  ;;  %v4960_v59 = vld [vmem:[#allocation10_spill] sm:$0xff] }
 0x153   :  { %1414 = vmatpush1.bf16.msra.mxu0 %v4122_v60 }
 0x154   :  { %1455 = vmatpush1.bf16.msra.mxu1 %v4127_v61  ;;  %1415 = vmatprep.subr.bf16.mxu0 %v4138_v0 }
 0x155   :  { %1456 = vmatprep.subr.bf16.mxu1 %v4143_v2 }
 0x157   :  { %1416 = vmatpush1.bf16.msra.mxu0 %v4157_v4 }
 0x158   :  { %1457 = vmatpush1.bf16.msra.mxu1 %v4162_v5  ;;  %1417 = vmatprep.subr.bf16.mxu0 %v4954_v36  ;;  %v4545_v36 = vld [vmem:[%s4915_s4 + $0x84] ss:$16 sps:$4 sm:$0xff]  }
 0x159   :  { %1458 = vmatprep.subr.bf16.mxu1 %v4955_v37  ;;  %v4550_v37 = vld [vmem:[%s4915_s4 + $0x88] ss:$16 sps:$4 sm:$0xff]  }
 0x15b   :  { %1418 = vmatpush1.bf16.msra.mxu0 %v4956_v38  ;;  %v4555_v38 = vld [vmem:[%s4915_s4 + $0x8c] ss:$16 sps:$4 sm:$0xff]  }
 0x15c   :  { %1459 = vmatpush1.bf16.msra.mxu1 %v4957_v39  ;;  %1712 = vmatprep.subr.bf16.mxu0 %v4468_v6  ;;  %v4560_v39 = vld [vmem:[%s4915_s4 + $0x64] ss:$16 sps:$4 sm:$0xff]  }
 0x15d   :  { %1753 = vmatprep.subr.bf16.mxu1 %v4473_v17 }
 0x1fe   :  { %v1128_v40 = vpop.f32.mrf.mxu0 }
 0x1ff   :  { %v1176_v41 = vadd.f32 %v1128_v40, %v4294_v19  ;;  %v1169_v42 = vpop.f32.mrf.mxu1  ;;  %v4566_v40 = vld [vmem:[%s4915_s4 + $0x6c] ss:$16 sps:$4 sm:$0xff]  }
 0x200   :  { %v1130_v43 = vpop.f32.mrf.mxu0  ;;  %v1178_v60 = vadd.f32 %v1169_v42, %v4960_v59  ;;  %v4579_v42 = vld [vmem:[%s4915_s4 + $0x68] ss:$16 sps:$4 sm:$0xff]  }
 0x201   :  { %v3283_v45 = vmul.f32 -1.442695, %v1176_v41  ;;  %v1177_v47 = vadd.f32 %v1130_v43, %v4958_v46  ;;  %v1171_v48 = vpop.f32.mrf.mxu1  ;;  %v4574_v41 = vld [vmem:[%s4915_s4 + $0x60] ss:$16 sps:$4 sm:$0xff]   ;;  %v4586_v43 = vld [vmem:[%s4915_s4 + $0x44] ss:$16 sps:$4 sm:$0xff]  }
 0x202   :  { %v1132_v49 = vpop.f32.mrf.mxu0  ;;  %v1179_v58 = vadd.f32 %v1171_v48, %v4959_v57  ;;  %v4598_v46 = vld [vmem:[%s4915_s4 + $0x40] ss:$16 sps:$4 sm:$0xff]   ;;  %v4610_v48 = vld [vmem:[%s4915_s4 + $0x24] ss:$16 sps:$4 sm:$0xff]  }
 0x203   :  { %3713 = vpow2.f32 %v3283_v45  ;;  %v3284_v50 = vmul.f32 -1.442695, %v1177_v47  ;;  %v1173_v51 = vpop.f32.mrf.mxu1  ;;  %v4591_v45 = vld [vmem:[%s4915_s4 + $0x4c] ss:$16 sps:$4 sm:$0xff]   ;;  %v4603_v47 = vld [vmem:[%s4915_s4 + $0x48] ss:$16 sps:$4 sm:$0xff]  }
 0x204   :  { %v1133_v52 = vpop.f32.mrf.mxu0  ;;  %v3285_v61 = vmul.f32 -1.442695, %v1179_v58  ;;  %v4615_v49 = vld [vmem:[%s4915_s4 + $0x2c] ss:$16 sps:$4 sm:$0xff]   ;;  %v4627_v51 = vld [vmem:[%s4915_s4 + $0x28] ss:$16 sps:$4 sm:$0xff]  }
 0x205   :  { %3715 = vpow2.f32 %v3284_v50  ;;  %v1174_v56 = vpop.f32.mrf.mxu1  ;;  %v4622_v50 = vld [vmem:[%s4915_s4 + $0x20] ss:$16 sps:$4 sm:$0xff]   ;;  %v4634_v52 = vld [vmem:[%s4915_s4 + $0x4] ss:$16 sps:$4 sm:$0xff]   ;;  %v4651_v58 = vld [vmem:[%s4915_s4 + $0x8] ss:$16 sps:$4 sm:$0xff]  }
 0x206   :  { %3717 = vtanh.f32 %v1178_v60  ;;  %v4639_v56 = vld [vmem:[%s4915_s4 + $0xc] ss:$16 sps:$4 sm:$0xff]   ;;  %v4646_v57 = vld [vmem:[%s4915_s4] ss:$16 sps:$4 sm:$0xff]  }
 0x207   :  { %3719 = vpow2.f32 %v3285_v61  ;;  %v4961_v60 = vld [vmem:[#allocation13_spill] sm:$0xff] }
 0x210   :  { %v3714_v0 = vpop.eup %3713 }
 0x211   :  { %v1183_v2 = vadd.f32 1.0, %v3714_v0 }
 0x212   :  { %v3716_v4 = vpop.eup %3715 }
 0x213   :  { %3721 = vrcp.f32 %v1183_v2  ;;  %v1189_v5 = vadd.f32 1.0, %v3716_v4  ;;  %v3718_v19 = vpop.eup %3717 }
 0x214   :  { %v3720_v20 = vpop.eup %3719 }
 0x215   :  { %3723 = vrcp.f32 %v1189_v5  ;;  %v1196_v11 = vadd.f32 1.0, %v3720_v20  ;;  %v4962_v5 = vld [vmem:[#allocation15_spill] sm:$0xff] }
 0x217   :  { %3725 = vrcp.f32 %v1196_v11 }
 0x220   :  { %v3722_v23 = vpop.eup %3721 }
 0x221   :  { %v1200_v15 = vmul.f32 %v3722_v23, %v3718_v19 }
 0x222   :  { %v3724_v25 = vpop.eup %3723 }
 0x223   :  { %v1199_v35 = vmul.f32 %v3724_v25, %v4413_v62  ;;  %v4507_v62 = vld [vmem:[%s4915_s4 + $0xc8] ss:$16 sps:$4 sm:$0xff]  }
 0x224   :  { %v3726_v8 = vpop.eup %3725 }
 0x225   :  { %v4459_v18 = vadd.f32 %v1200_v15, %v1199_v35 }
 0x227   :  { %3727 = vtanh.f32 %v4459_v18 }
 0x234   :  { %v3728_v26 = vpop.eup %3727 }
 0x235   :  { %v1203_v10 = vmul.f32 %v3728_v26, %v3726_v8  ;;  %v4963_v8 = vld [vmem:[#allocation16_spill] sm:$0xff] }
 0x237   :  { %v3076_v1 = vmul.f32 %v4419_v31, %v1203_v10  ;;  %v1210_v34 = vpack.c.bf16 %v1203_v10, %v1203_v10  ;;  %v4964_v10 = vld [vmem:[#allocation14_spill] sm:$0xff] }
 0x239   :  { %3085 = vadd.xlane.f32.xlu1 %v3076_v1  ;;  %1436 = vmatmul.mubr.bf16.vlgmr.msra.gmra.mxu0 %v1210_v34 }
 0x23a   :  { %1477 = vmatmul.mubr.bf16.vlgmr.msra.gmra.mxu1 %v1210_v34  ;;  %1744 = vmatprep.mubr.bf16.mxu0 %v4953_v32 }
 0x23b   :  { %1785 = vmatprep.mubr.bf16.mxu1 %v4953_v32  ;;  %1713 = vmatpush1.bf16.msra.mxu0 %v4478_v16 }
 0x23c   :  { %1754 = vmatpush1.bf16.msra.mxu1 %v4483_v21  ;;  %1714 = vmatprep.subr.bf16.mxu0 %v4492_v63 }
 0x23d   :  { %1755 = vmatprep.subr.bf16.mxu1 %v4497_v24 }
 0x23f   :  { %1715 = vmatpush1.bf16.msra.mxu0 %v4502_v28 }
 0x240   :  { %1756 = vmatpush1.bf16.msra.mxu1 %v4507_v62  ;;  %1716 = vmatprep.subr.bf16.mxu0 %v4516_v53 }
 0x241   :  { %1757 = vmatprep.subr.bf16.mxu1 %v4521_v14 }
 0x243   :  { %1717 = vmatpush1.bf16.msra.mxu0 %v4526_v44 }
 0x244   :  { %1758 = vmatpush1.bf16.msra.mxu1 %v4531_v13  ;;  %1718 = vmatprep.subr.bf16.mxu0 %v4545_v36 }
 0x245   :  { %1759 = vmatprep.subr.bf16.mxu1 %v4555_v38 }
 0x247   :  { %1719 = vmatpush1.bf16.msra.mxu0 %v4540_v27 }
 0x248   :  { %1760 = vmatpush1.bf16.msra.mxu1 %v4550_v37  ;;  %1720 = vmatprep.subr.bf16.mxu0 %v4560_v39 }
 0x249   :  { %1761 = vmatprep.subr.bf16.mxu1 %v4566_v40 }
 0x24b   :  { %1721 = vmatpush1.bf16.msra.mxu0 %v4574_v41 }
 0x24c   :  { %1762 = vmatpush1.bf16.msra.mxu1 %v4579_v42  ;;  %1722 = vmatprep.subr.bf16.mxu0 %v4586_v43 }
 0x24d   :  { %1763 = vmatprep.subr.bf16.mxu1 %v4591_v45 }
 0x24f   :  { %1723 = vmatpush1.bf16.msra.mxu0 %v4598_v46 }
 0x250   :  { %1764 = vmatpush1.bf16.msra.mxu1 %v4603_v47  ;;  %1724 = vmatprep.subr.bf16.mxu0 %v4610_v48 }
 0x251   :  { %1765 = vmatprep.subr.bf16.mxu1 %v4615_v49 }
 0x253   :  { %1725 = vmatpush1.bf16.msra.mxu0 %v4622_v50 }
 0x254   :  { %1766 = vmatpush1.bf16.msra.mxu1 %v4627_v51  ;;  %1726 = vmatprep.subr.bf16.mxu0 %v4634_v52 }
 0x255   :  { %1767 = vmatprep.subr.bf16.mxu1 %v4639_v56 }
 0x257   :  { %1727 = vmatpush1.bf16.msra.mxu0 %v4646_v57 }
 0x258   :  { %1768 = vmatpush1.bf16.msra.mxu1 %v4651_v58  ;;  %2021 = vmatprep.subr.bf16.mxu0 %v4468_v6 }
 0x259   :  { %2062 = vmatprep.subr.bf16.mxu1 %v4473_v17 }
 0x2f9   :  { %v1437_v59 = vpop.f32.mrf.mxu0 }
 0x2fa   :  { %v1485_v61 = vadd.f32 %v1437_v59, %v4961_v60  ;;  %v1478_v0 = vpop.f32.mrf.mxu1 }
 0x2fb   :  { %v1439_v2 = vpop.f32.mrf.mxu0  ;;  %v1487_v1 = vadd.f32 %v1478_v0, %v4964_v10 }
 0x2fc   :  { %v3318_v4 = vmul.f32 -1.442695, %v1485_v61  ;;  %v1486_v19 = vadd.f32 %v1439_v2, %v4962_v5  ;;  %v1480_v20 = vpop.f32.mrf.mxu1 }
 0x2fd   :  { %v1441_v23 = vpop.f32.mrf.mxu0  ;;  %v1488_v26 = vadd.f32 %v1480_v20, %v4963_v8 }
 0x2fe   :  { %3729 = vpow2.f32 %v3318_v4  ;;  %v3319_v15 = vmul.f32 -1.442695, %v1486_v19  ;;  %v1482_v25 = vpop.f32.mrf.mxu1 }
 0x2ff   :  { %v1442_v11 = vpop.f32.mrf.mxu0  ;;  %v3320_v34 = vmul.f32 -1.442695, %v1488_v26  ;;  %v4965_v26 = vld [vmem:[#allocation17_spill] sm:$0xff] }
 0x300   :  { %3731 = vpow2.f32 %v3319_v15  ;;  %v1483_v35 = vpop.f32.mrf.mxu1 }
 0x301   :  { %3733 = vtanh.f32 %v1487_v1 }
 0x302   :  { %3735 = vpow2.f32 %v3320_v34 }
 0x30b   :  { %v3730_v33 = vpop.eup %3729 }
 0x30c   :  { %v1492_v59 = vadd.f32 1.0, %v3730_v33 }
 0x30d   :  { %v3732_v60 = vpop.eup %3731 }
 0x30e   :  { %3737 = vrcp.f32 %v1492_v59  ;;  %v1498_v61 = vadd.f32 1.0, %v3732_v60  ;;  %v3734_v2 = vpop.eup %3733  ;;  %v4966_v60 = vld [vmem:[#allocation19_spill] sm:$0xff] }
 0x30f   :  { %v3736_v4 = vpop.eup %3735 }
 0x310   :  { %3739 = vrcp.f32 %v1498_v61  ;;  %v1505_v15 = vadd.f32 1.0, %v3736_v4 }
 0x312   :  { %3741 = vrcp.f32 %v1505_v15 }
 0x31b   :  { %v3738_v5 = vpop.eup %3737 }
 0x31c   :  { %v1509_v19 = vmul.f32 %v3738_v5, %v3734_v2 }
 0x31d   :  { %v3740_v23 = vpop.eup %3739 }
 0x31e   :  { %v1508_v25 = vmul.f32 %v3740_v23, %v4459_v18 }
 0x31f   :  { %v3742_v33 = vpop.eup %3741 }
 0x320   :  { %v4664_v20 = vadd.f32 %v1509_v19, %v1508_v25  ;;  %v4967_v25 = vld [vmem:[#allocation20_spill] sm:$0xff] }
 0x322   :  { %3743 = vtanh.f32 %v4664_v20 }
 0x32f   :  { %v3744_v0 = vpop.eup %3743 }
 0x330   :  { %v1512_v11 = vmul.f32 %v3744_v0, %v3742_v33  ;;  %v4968_v0 = vld [vmem:[#allocation18_spill] sm:$0xff] }
 0x332   :  { %v3077_v35 = vmul.f32 %v4419_v31, %v1512_v11  ;;  %v1519_v8 = vpack.c.bf16 %v1512_v11, %v1512_v11 }
 0x334   :  { %3087 = vadd.xlane.f32.xlu0 %v3077_v35  ;;  %1745 = vmatmul.mubr.bf16.vlgmr.msra.gmra.mxu0 %v1519_v8 }
 0x335   :  { %1786 = vmatmul.mubr.bf16.vlgmr.msra.gmra.mxu1 %v1519_v8  ;;  %2022 = vmatpush1.bf16.msra.mxu0 %v4478_v16 }
 0x336   :  { %2063 = vmatpush1.bf16.msra.mxu1 %v4483_v21  ;;  %2023 = vmatprep.subr.bf16.mxu0 %v4492_v63 }
 0x337   :  { %2064 = vmatprep.subr.bf16.mxu1 %v4497_v24  ;;  %2053 = vmatprep.mubr.bf16.mxu0 %v4953_v32 }
 0x338   :  { %2094 = vmatprep.mubr.bf16.mxu1 %v4953_v32 }
 0x339   :  { %2024 = vmatpush1.bf16.msra.mxu0 %v4502_v28 }
 0x33a   :  { %2065 = vmatpush1.bf16.msra.mxu1 %v4507_v62  ;;  %2025 = vmatprep.subr.bf16.mxu0 %v4516_v53 }
 0x33b   :  { %2066 = vmatprep.subr.bf16.mxu1 %v4521_v14 }
 0x33d   :  { %2026 = vmatpush1.bf16.msra.mxu0 %v4526_v44 }
 0x33e   :  { %2067 = vmatpush1.bf16.msra.mxu1 %v4531_v13  ;;  %2027 = vmatprep.subr.bf16.mxu0 %v4545_v36 }
 0x33f   :  { %2068 = vmatprep.subr.bf16.mxu1 %v4555_v38 }
 0x341   :  { %2028 = vmatpush1.bf16.msra.mxu0 %v4540_v27 }
 0x342   :  { %2069 = vmatpush1.bf16.msra.mxu1 %v4550_v37  ;;  %2029 = vmatprep.subr.bf16.mxu0 %v4560_v39 }
 0x343   :  { %2070 = vmatprep.subr.bf16.mxu1 %v4566_v40 }
 0x345   :  { %2030 = vmatpush1.bf16.msra.mxu0 %v4574_v41 }
 0x346   :  { %2071 = vmatpush1.bf16.msra.mxu1 %v4579_v42  ;;  %2031 = vmatprep.subr.bf16.mxu0 %v4586_v43 }
 0x347   :  { %2072 = vmatprep.subr.bf16.mxu1 %v4591_v45 }
 0x349   :  { %2032 = vmatpush1.bf16.msra.mxu0 %v4598_v46 }
 0x34a   :  { %2073 = vmatpush1.bf16.msra.mxu1 %v4603_v47  ;;  %2033 = vmatprep.subr.bf16.mxu0 %v4610_v48 }
 0x34b   :  { %2074 = vmatprep.subr.bf16.mxu1 %v4615_v49 }
 0x34d   :  { %2034 = vmatpush1.bf16.msra.mxu0 %v4622_v50 }
 0x34e   :  { %2075 = vmatpush1.bf16.msra.mxu1 %v4627_v51  ;;  %2035 = vmatprep.subr.bf16.mxu0 %v4634_v52 }
 0x34f   :  { %2076 = vmatprep.subr.bf16.mxu1 %v4639_v56 }
 0x351   :  { %2036 = vmatpush1.bf16.msra.mxu0 %v4646_v57 }
 0x352   :  { %2077 = vmatpush1.bf16.msra.mxu1 %v4651_v58  ;;  %2330 = vmatprep.subr.bf16.mxu0 %v4468_v6 }
 0x353   :  { %2371 = vmatprep.subr.bf16.mxu1 %v4473_v17 }
 0x3f4   :  { %v1746_v18 = vpop.f32.mrf.mxu0 }
 0x3f5   :  { %v1794_v10 = vadd.f32 %v1746_v18, %v4965_v26  ;;  %v1787_v1 = vpop.f32.mrf.mxu1 }
 0x3f6   :  { %v1748_v34 = vpop.f32.mrf.mxu0  ;;  %v1796_v11 = vadd.f32 %v1787_v1, %v4968_v0  ;;  %v4969_v0 = vld [vmem:[#allocation21_spill] sm:$0xff] }
 0x3f7   :  { %v3353_v59 = vmul.f32 -1.442695, %v1794_v10  ;;  %v1795_v61 = vadd.f32 %v1748_v34, %v4966_v60  ;;  %v1789_v2 = vpop.f32.mrf.mxu1 }
 0x3f8   :  { %v1750_v4 = vpop.f32.mrf.mxu0  ;;  %v1797_v33 = vadd.f32 %v1789_v2, %v4967_v25 }
 0x3f9   :  { %3745 = vpow2.f32 %v3353_v59  ;;  %v3354_v5 = vmul.f32 -1.442695, %v1795_v61  ;;  %v1791_v19 = vpop.f32.mrf.mxu1 }
 0x3fa   :  { %v1751_v23 = vpop.f32.mrf.mxu0  ;;  %v3355_v35 = vmul.f32 -1.442695, %v1797_v33 }
 0x3fb   :  { %3747 = vpow2.f32 %v3354_v5  ;;  %v1792_v15 = vpop.f32.mrf.mxu1 }
 0x3fc   :  { %3749 = vtanh.f32 %v1796_v11 }
 0x3fd   :  { %3751 = vpow2.f32 %v3355_v35 }
 0x406   :  { %v3746_v8 = vpop.eup %3745 }
 0x407   :  { %v1801_v18 = vadd.f32 1.0, %v3746_v8 }
 0x408   :  { %v3748_v26 = vpop.eup %3747 }
 0x409   :  { %3753 = vrcp.f32 %v1801_v18  ;;  %v1807_v10 = vadd.f32 1.0, %v3748_v26  ;;  %v3750_v34 = vpop.eup %3749  ;;  %v4970_v26 = vld [vmem:[#allocation23_spill] sm:$0xff] }
 0x40a   :  { %v3752_v59 = vpop.eup %3751 }
 0x40b   :  { %3755 = vrcp.f32 %v1807_v10  ;;  %v1814_v5 = vadd.f32 1.0, %v3752_v59 }
 0x40d   :  { %3757 = vrcp.f32 %v1814_v5 }
 0x416   :  { %v3754_v60 = vpop.eup %3753 }
 0x417   :  { %v1818_v61 = vmul.f32 %v3754_v60, %v3750_v34 }
 0x418   :  { %v3756_v4 = vpop.eup %3755 }
 0x419   :  { %v1817_v19 = vmul.f32 %v3756_v4, %v4664_v20 }
 0x41a   :  { %v3758_v1 = vpop.eup %3757 }
 0x41b   :  { %v4707_v2 = vadd.f32 %v1818_v61, %v1817_v19  ;;  %v4971_v19 = vld [vmem:[#allocation24_spill] sm:$0xff] }
 0x41d   :  { %3759 = vtanh.f32 %v4707_v2 }
 0x42a   :  { %v3760_v23 = vpop.eup %3759 }
 0x42b   :  { %v1821_v15 = vmul.f32 %v3760_v23, %v3758_v1  ;;  %v4972_v1 = vld [vmem:[#allocation22_spill] sm:$0xff] }
 0x42d   :  { %v3078_v25 = vmul.f32 %v4419_v31, %v1821_v15  ;;  %v1828_v33 = vpack.c.bf16 %v1821_v15, %v1821_v15 }
 0x42f   :  { %3089 = vadd.xlane.f32.xlu0 %v3078_v25  ;;  %2054 = vmatmul.mubr.bf16.vlgmr.msra.gmra.mxu0 %v1828_v33 }
 0x430   :  { %2095 = vmatmul.mubr.bf16.vlgmr.msra.gmra.mxu1 %v1828_v33  ;;  %2331 = vmatpush1.bf16.msra.mxu0 %v4478_v16 }
 0x431   :  { %2372 = vmatpush1.bf16.msra.mxu1 %v4483_v21  ;;  %2332 = vmatprep.subr.bf16.mxu0 %v4492_v63 }
 0x432   :  { %2373 = vmatprep.subr.bf16.mxu1 %v4497_v24  ;;  %2362 = vmatprep.mubr.bf16.mxu0 %v4953_v32 }
 0x433   :  { %2403 = vmatprep.mubr.bf16.mxu1 %v4953_v32 }
 0x434   :  { %2333 = vmatpush1.bf16.msra.mxu0 %v4502_v28 }
 0x435   :  { %2374 = vmatpush1.bf16.msra.mxu1 %v4507_v62  ;;  %2334 = vmatprep.subr.bf16.mxu0 %v4516_v53 }
 0x436   :  { %2375 = vmatprep.subr.bf16.mxu1 %v4521_v14 }
 0x438   :  { %2335 = vmatpush1.bf16.msra.mxu0 %v4526_v44 }
 0x439   :  { %2376 = vmatpush1.bf16.msra.mxu1 %v4531_v13  ;;  %2336 = vmatprep.subr.bf16.mxu0 %v4545_v36 }
 0x43a   :  { %2377 = vmatprep.subr.bf16.mxu1 %v4555_v38 }
 0x43c   :  { %2337 = vmatpush1.bf16.msra.mxu0 %v4540_v27 }
 0x43d   :  { %2378 = vmatpush1.bf16.msra.mxu1 %v4550_v37  ;;  %2338 = vmatprep.subr.bf16.mxu0 %v4560_v39 }
 0x43e   :  { %2379 = vmatprep.subr.bf16.mxu1 %v4566_v40 }
 0x440   :  { %2339 = vmatpush1.bf16.msra.mxu0 %v4574_v41 }
 0x441   :  { %2380 = vmatpush1.bf16.msra.mxu1 %v4579_v42  ;;  %2340 = vmatprep.subr.bf16.mxu0 %v4586_v43 }
 0x442   :  { %2381 = vmatprep.subr.bf16.mxu1 %v4591_v45 }
 0x444   :  { %2341 = vmatpush1.bf16.msra.mxu0 %v4598_v46 }
 0x445   :  { %2382 = vmatpush1.bf16.msra.mxu1 %v4603_v47  ;;  %2342 = vmatprep.subr.bf16.mxu0 %v4610_v48 }
 0x446   :  { %2383 = vmatprep.subr.bf16.mxu1 %v4615_v49 }
 0x448   :  { %2343 = vmatpush1.bf16.msra.mxu0 %v4622_v50 }
 0x449   :  { %2384 = vmatpush1.bf16.msra.mxu1 %v4627_v51  ;;  %2344 = vmatprep.subr.bf16.mxu0 %v4634_v52 }
 0x44a   :  { %2385 = vmatprep.subr.bf16.mxu1 %v4639_v56 }
 0x44c   :  { %2345 = vmatpush1.bf16.msra.mxu0 %v4646_v57 }
 0x44d   :  { %2386 = vmatpush1.bf16.msra.mxu1 %v4651_v58  ;;  %2639 = vmatprep.subr.bf16.mxu0 %v4468_v6 }
 0x44e   :  { %2680 = vmatprep.subr.bf16.mxu1 %v4473_v17 }
 0x4ef   :  { %v2055_v20 = vpop.f32.mrf.mxu0 }
 0x4f0   :  { %v2103_v11 = vadd.f32 %v2055_v20, %v4969_v0  ;;  %v2096_v35 = vpop.f32.mrf.mxu1 }
 0x4f1   :  { %v2057_v8 = vpop.f32.mrf.mxu0  ;;  %v2105_v17 = vadd.f32 %v2096_v35, %v4972_v1  ;;  %v3654_v1 = vld [vmem:[%s4915_s4 + $0xec] ss:$16 sps:$4 sm:$0xff]  }
 0x4f2   :  { %v3388_v18 = vmul.f32 -1.442695, %v2103_v11  ;;  %v2104_v10 = vadd.f32 %v2057_v8, %v4970_v26  ;;  %v2098_v34 = vpop.f32.mrf.mxu1 }
 0x4f3   :  { %v2059_v59 = vpop.f32.mrf.mxu0  ;;  %v2106_v6 = vadd.f32 %v2098_v34, %v4971_v19 }
 0x4f4   :  { %3761 = vpow2.f32 %v3388_v18  ;;  %v3389_v60 = vmul.f32 -1.442695, %v2104_v10  ;;  %v2100_v61 = vpop.f32.mrf.mxu1 }
 0x4f5   :  { %v2060_v4 = vpop.f32.mrf.mxu0  ;;  %v3390_v23 = vmul.f32 -1.442695, %v2106_v6  ;;  %v3651_v6 = vld [vmem:[%s4915_s4 + $0xe4] ss:$16 sps:$4 sm:$0xff]  }
 0x4f6   :  { %3763 = vpow2.f32 %v3389_v60  ;;  %v2101_v5 = vpop.f32.mrf.mxu1 }
 0x4f7   :  { %3765 = vtanh.f32 %v2105_v17  ;;  %v3652_v17 = vld [vmem:[%s4915_s4 + $0xe8] ss:$16 sps:$4 sm:$0xff]  }
 0x4f8   :  { %3767 = vpow2.f32 %v3390_v23  ;;  %v3660_v23 = vld [vmem:[%s4915_s4 + $0xcc] ss:$16 sps:$4 sm:$0xff]  }
 0x501   :  { %v3762_v15 = vpop.eup %3761 }
 0x502   :  { %v2110_v25 = vadd.f32 1.0, %v3762_v15  ;;  %v3655_v15 = vld [vmem:[%s4915_s4 + $0xc0] ss:$16 sps:$4 sm:$0xff]  }
 0x503   :  { %v3764_v33 = vpop.eup %3763 }
 0x504   :  { %3769 = vrcp.f32 %v2110_v25  ;;  %v2116_v20 = vadd.f32 1.0, %v3764_v33  ;;  %v3766_v0 = vpop.eup %3765  ;;  %v3658_v25 = vld [vmem:[%s4915_s4 + $0xc8] ss:$16 sps:$4 sm:$0xff]   ;;  %v3663_v33 = vld [vmem:[%s4915_s4 + $0xa4] ss:$16 sps:$4 sm:$0xff]  }
 0x505   :  { %v3768_v11 = vpop.eup %3767 }
 0x506   :  { %3771 = vrcp.f32 %v2116_v20  ;;  %v2123_v10 = vadd.f32 1.0, %v3768_v11  ;;  %v3666_v20 = vld [vmem:[%s4915_s4 + $0xac] ss:$16 sps:$4 sm:$0xff]   ;;  %v3664_v11 = vld [vmem:[%s4915_s4 + $0xa8] ss:$16 sps:$4 sm:$0xff]  }
 0x508   :  { %3773 = vrcp.f32 %v2123_v10  ;;  %v3672_v10 = vld [vmem:[%s4915_s4 + $0x8c] ss:$16 sps:$4 sm:$0xff]  }
 0x511   :  { %v3770_v8 = vpop.eup %3769 }
 0x512   :  { %v2127_v18 = vmul.f32 %v3770_v8, %v3766_v0  ;;  %v3661_v0 = vld [vmem:[%s4915_s4 + $0xa0] ss:$16 sps:$4 sm:$0xff]  }
 0x513   :  { %v3772_v26 = vpop.eup %3771  ;;  %v3667_v8 = vld [vmem:[%s4915_s4 + $0x80] ss:$16 sps:$4 sm:$0xff]  }
 0x514   :  { %v2126_v59 = vmul.f32 %v3772_v26, %v4707_v2  ;;  %v3670_v26 = vld [vmem:[%s4915_s4 + $0x88] ss:$16 sps:$4 sm:$0xff]  }
 0x515   :  { %v3774_v35 = vpop.eup %3773 }
 0x516   :  { %v4750_v34 = vadd.f32 %v2127_v18, %v2126_v59  ;;  %v3669_v18 = vld [vmem:[%s4915_s4 + $0x84] ss:$16 sps:$4 sm:$0xff]  }
 0x517   :  { %v3675_v59 = vld [vmem:[%s4915_s4 + $0x64] ss:$16 sps:$4 sm:$0xff]  }
 0x518   :  { %3775 = vtanh.f32 %v4750_v34 }
 0x525   :  { %v3776_v60 = vpop.eup %3775 }
 0x526   :  { %v2130_v61 = vmul.f32 %v3776_v60, %v3774_v35  ;;  %v3673_v35 = vld [vmem:[%s4915_s4 + $0x60] ss:$16 sps:$4 sm:$0xff]   ;;  %v3676_v60 = vld [vmem:[%s4915_s4 + $0x68] ss:$16 sps:$4 sm:$0xff]  }
 0x528   :  { %v3079_v4 = vmul.f32 %v4419_v31, %v2130_v61  ;;  %v2137_v5 = vpack.c.bf16 %v2130_v61, %v2130_v61  ;;  %v3681_v61 = vld [vmem:[%s4915_s4 + $0x44] ss:$16 sps:$4 sm:$0xff]  }
 0x52a   :  { %3091 = vadd.xlane.f32.xlu1 %v3079_v4  ;;  %2363 = vmatmul.mubr.bf16.vlgmr.msra.gmra.mxu0 %v2137_v5  ;;  %v3684_v4 = vld [vmem:[%s4915_s4 + $0x4c] ss:$16 sps:$4 sm:$0xff]  }
 0x52b   :  { %2404 = vmatmul.mubr.bf16.vlgmr.msra.gmra.mxu1 %v2137_v5  ;;  %2640 = vmatpush1.bf16.msra.mxu0 %v4478_v16  ;;  %v3679_v5 = vld [vmem:[%s4915_s4 + $0x40] ss:$16 sps:$4 sm:$0xff]  }
 0x52c   :  { %2681 = vmatpush1.bf16.msra.mxu1 %v4483_v21  ;;  %2641 = vmatprep.subr.bf16.mxu0 %v4492_v63  ;;  %v4973_v21 = vld [vmem:[#allocation25_spill] sm:$0xff] }
 0x52d   :  { %2682 = vmatprep.subr.bf16.mxu1 %v4497_v24  ;;  %2671 = vmatprep.mubr.bf16.mxu0 %v4953_v32 }
 0x52e   :  { %2712 = vmatprep.mubr.bf16.mxu1 %v4953_v32 }
 0x52f   :  { %2642 = vmatpush1.bf16.msra.mxu0 %v4502_v28 }
 0x530   :  { %2683 = vmatpush1.bf16.msra.mxu1 %v4507_v62  ;;  %2643 = vmatprep.subr.bf16.mxu0 %v4516_v53 }
 0x531   :  { %2684 = vmatprep.subr.bf16.mxu1 %v4521_v14 }
 0x533   :  { %2644 = vmatpush1.bf16.msra.mxu0 %v4526_v44 }
 0x534   :  { %2685 = vmatpush1.bf16.msra.mxu1 %v4531_v13  ;;  %2645 = vmatprep.subr.bf16.mxu0 %v4545_v36 }
 0x535   :  { %2686 = vmatprep.subr.bf16.mxu1 %v4555_v38 }
 0x537   :  { %2646 = vmatpush1.bf16.msra.mxu0 %v4540_v27 }
 0x538   :  { %2687 = vmatpush1.bf16.msra.mxu1 %v4550_v37  ;;  %2647 = vmatprep.subr.bf16.mxu0 %v4560_v39  ;;  %v4974_v39 = vld [vmem:[#allocation26_spill] sm:$0xff] }
 0x539   :  { %2688 = vmatprep.subr.bf16.mxu1 %v4566_v40 }
 0x53b   :  { %2648 = vmatpush1.bf16.msra.mxu0 %v4574_v41 }
 0x53c   :  { %2689 = vmatpush1.bf16.msra.mxu1 %v4579_v42  ;;  %2649 = vmatprep.subr.bf16.mxu0 %v4586_v43 }
 0x53d   :  { %2690 = vmatprep.subr.bf16.mxu1 %v4591_v45 }
 0x53f   :  { %2650 = vmatpush1.bf16.msra.mxu0 %v4598_v46 }
 0x540   :  { %2691 = vmatpush1.bf16.msra.mxu1 %v4603_v47  ;;  %2651 = vmatprep.subr.bf16.mxu0 %v4610_v48 }
 0x541   :  { %2692 = vmatprep.subr.bf16.mxu1 %v4615_v49 }
 0x543   :  { %2652 = vmatpush1.bf16.msra.mxu0 %v4622_v50 }
 0x544   :  { %2693 = vmatpush1.bf16.msra.mxu1 %v4627_v51  ;;  %2653 = vmatprep.subr.bf16.mxu0 %v4634_v52 }
 0x545   :  { %2694 = vmatprep.subr.bf16.mxu1 %v4639_v56 }
 0x547   :  { %2654 = vmatpush1.bf16.msra.mxu0 %v4646_v57 }
 0x548   :  { %2695 = vmatpush1.bf16.msra.mxu1 %v4651_v58  ;;  %2948 = vmatprep.subr.bf16.mxu0 %v3651_v6 }
 0x549   :  { %2989 = vmatprep.subr.bf16.mxu1 %v3654_v1 }
 0x5ea   :  { %v2364_v16 = vpop.f32.mrf.mxu0 }
 0x5eb   :  { %v2412_v63 = vadd.f32 %v2364_v16, %v4973_v21  ;;  %v2405_v24 = vpop.f32.mrf.mxu1  ;;  %v3682_v16 = vld [vmem:[%s4915_s4 + $0x48] ss:$16 sps:$4 sm:$0xff]   ;;  %v3687_v21 = vld [vmem:[%s4915_s4 + $0x24] ss:$16 sps:$4 sm:$0xff]  }
 0x5ec   :  { %v2366_v28 = vpop.f32.mrf.mxu0  ;;  %v2414_v40 = vadd.f32 %v2405_v24, %v4974_v39  ;;  %v3685_v24 = vld [vmem:[%s4915_s4 + $0x20] ss:$16 sps:$4 sm:$0xff]  }
 0x5ed   :  { %v3423_v62 = vmul.f32 -1.442695, %v2412_v63  ;;  %v2413_v53 = vadd.f32 %v2366_v28, %v4370_v22  ;;  %v2407_v14 = vpop.f32.mrf.mxu1  ;;  %v3690_v63 = vld [vmem:[%s4915_s4 + $0x2c] ss:$16 sps:$4 sm:$0xff]   ;;  %v3688_v28 = vld [vmem:[%s4915_s4 + $0x28] ss:$16 sps:$4 sm:$0xff]  }
 0x5ee   :  { %v2368_v44 = vpop.f32.mrf.mxu0  ;;  %v2415_v38 = vadd.f32 %v2407_v14, %v4373_v30  ;;  %v3691_v14 = vld [vmem:[%s4915_s4] ss:$16 sps:$4 sm:$0xff]  }
 0x5ef   :  { %3777 = vpow2.f32 %v3423_v62  ;;  %v3424_v13 = vmul.f32 -1.442695, %v2413_v53  ;;  %v2409_v27 = vpop.f32.mrf.mxu1  ;;  %v3693_v62 = vld [vmem:[%s4915_s4 + $0x4] ss:$16 sps:$4 sm:$0xff]   ;;  %v3696_v53 = vld [vmem:[%s4915_s4 + $0xc] ss:$16 sps:$4 sm:$0xff]  }
 0x5f0   :  { %v2369_v36 = vpop.f32.mrf.mxu0  ;;  %v3425_v41 = vmul.f32 -1.442695, %v2415_v38  ;;  %v3694_v44 = vld [vmem:[%s4915_s4 + $0x8] ss:$16 sps:$4 sm:$0xff]  }
 0x5f1   :  { %3779 = vpow2.f32 %v3424_v13  ;;  %v2410_v37 = vpop.f32.mrf.mxu1  ;;  %v13_v13 = vstv %s4920_s7 }
 0x5f2   :  { %3781 = vtanh.f32 %v2414_v40  ;;  %14 = vst [vmem:[#allocation4] sm:$0x1] %v13_v13 }
 0x5f3   :  { %3783 = vpow2.f32 %v3425_v41 }
 0x5fc   :  { %v3778_v42 = vpop.eup %3777 }
 0x5fd   :  { %v2419_v43 = vadd.f32 1.0, %v3778_v42 }
 0x5fe   :  { %v3780_v45 = vpop.eup %3779 }
 0x5ff   :  { %3785 = vrcp.f32 %v2419_v43  ;;  %v2425_v22 = vadd.f32 1.0, %v3780_v45  ;;  %v3782_v46 = vpop.eup %3781 }
 0x600   :  { %v3784_v47 = vpop.eup %3783 }
 0x601   :  { %3787 = vrcp.f32 %v2425_v22  ;;  %v2432_v51 = vadd.f32 1.0, %v3784_v47 }
 0x603   :  { %3789 = vrcp.f32 %v2432_v51 }
 0x60c   :  { %v3786_v48 = vpop.eup %3785 }
 0x60d   :  { %v2436_v49 = vmul.f32 %v3786_v48, %v3782_v46 }
 0x60e   :  { %v3788_v50 = vpop.eup %3787 }
 0x60f   :  { %v2435_v52 = vmul.f32 %v3788_v50, %v4750_v34  ;;  %v3678_v34 = vld [vmem:[%s4915_s4 + $0x6c] ss:$16 sps:$4 sm:$0xff]  }
 0x610   :  { %v3790_v56 = vpop.eup %3789 }
 0x611   :  { %v4791_v30 = vadd.f32 %v2436_v49, %v2435_v52 }
 0x613   :  { %3791 = vtanh.f32 %v4791_v30 }
 0x620   :  { %v3792_v57 = vpop.eup %3791 }
 0x621   :  { %v2439_v58 = vmul.f32 %v3792_v57, %v3790_v56 }
 0x623   :  { %v3080_v2 = vmul.f32 %v4419_v31, %v2439_v58  ;;  %v2446_v19 = vpack.c.bf16 %v2439_v58, %v2439_v58  ;;  %v3649_v31 = vld [vmem:[%s4915_s4 + $0xe0] ss:$16 sps:$4 sm:$0xff]  }
 0x625   :  { %3093 = vadd.xlane.f32.xlu0 %v3080_v2  ;;  %2672 = vmatmul.mubr.bf16.vlgmr.msra.gmra.mxu0 %v2446_v19 }
 0x626   :  { %2713 = vmatmul.mubr.bf16.vlgmr.msra.gmra.mxu1 %v2446_v19  ;;  %2980 = vmatprep.mubr.bf16.mxu0 %v4953_v32 }
 0x627   :  { %3021 = vmatprep.mubr.bf16.mxu1 %v4953_v32  ;;  %2949 = vmatpush1.bf16.msra.mxu0 %v3649_v31  ;;  %v3657_v32 = vld [vmem:[%s4915_s4 + $0xc4] ss:$16 sps:$4 sm:$0xff]  }
 0x628   :  { %2990 = vmatpush1.bf16.msra.mxu1 %v3652_v17  ;;  %2950 = vmatprep.subr.bf16.mxu0 %v3657_v32  ;;  %v3825_v17 = vld [vmem:[%s4919_s6] ss:$0 sm:$0xff] }
 0x629   :  { %2991 = vmatprep.subr.bf16.mxu1 %v3660_v23 }
 0x62b   :  { %2951 = vmatpush1.bf16.msra.mxu0 %v3655_v15  ;;  %v3497_v15 = vld [vmem:[#allocation4] ss:$0 sm:$0xff] }
 0x62c   :  { %2992 = vmatpush1.bf16.msra.mxu1 %v3658_v25  ;;  %2952 = vmatprep.subr.bf16.mxu0 %v3663_v33 }
 0x62d   :  { %2993 = vmatprep.subr.bf16.mxu1 %v3666_v20 }
 0x62f   :  { %2953 = vmatpush1.bf16.msra.mxu0 %v3661_v0 }
 0x630   :  { %2994 = vmatpush1.bf16.msra.mxu1 %v3664_v11  ;;  %2954 = vmatprep.subr.bf16.mxu0 %v3669_v18 }
 0x631   :  { %2995 = vmatprep.subr.bf16.mxu1 %v3672_v10 }
 0x633   :  { %2955 = vmatpush1.bf16.msra.mxu0 %v3667_v8 }
 0x634   :  { %2996 = vmatpush1.bf16.msra.mxu1 %v3670_v26  ;;  %2956 = vmatprep.subr.bf16.mxu0 %v3675_v59 }
 0x635   :  { %2997 = vmatprep.subr.bf16.mxu1 %v3678_v34 }
 0x637   :  { %2957 = vmatpush1.bf16.msra.mxu0 %v3673_v35 }
 0x638   :  { %2998 = vmatpush1.bf16.msra.mxu1 %v3676_v60  ;;  %2958 = vmatprep.subr.bf16.mxu0 %v3681_v61  ;;  %v4975_v60 = vld [vmem:[#allocation27_spill] sm:$0xff] }
 0x639   :  { %2999 = vmatprep.subr.bf16.mxu1 %v3684_v4 }
 0x63b   :  { %2959 = vmatpush1.bf16.msra.mxu0 %v3679_v5 }
 0x63c   :  { %3000 = vmatpush1.bf16.msra.mxu1 %v3682_v16  ;;  %2960 = vmatprep.subr.bf16.mxu0 %v3687_v21 }
 0x63d   :  { %3001 = vmatprep.subr.bf16.mxu1 %v3690_v63 }
 0x63f   :  { %2961 = vmatpush1.bf16.msra.mxu0 %v3685_v24 }
 0x640   :  { %3002 = vmatpush1.bf16.msra.mxu1 %v3688_v28  ;;  %2962 = vmatprep.subr.bf16.mxu0 %v3693_v62 }
 0x641   :  { %3003 = vmatprep.subr.bf16.mxu1 %v3696_v53 }
 0x643   :  { %2963 = vmatpush1.bf16.msra.mxu0 %v3691_v14 }
 0x644   :  { %3004 = vmatpush1.bf16.msra.mxu1 %v3694_v44 }
 0x6e5   :  { %v2673_v27 = vpop.f32.mrf.mxu0 }
 0x6e6   :  { %v2721_v36 = vadd.f32 %v2673_v27, %v4379_v12  ;;  %v2714_v37 = vpop.f32.mrf.mxu1 }
 0x6e7   :  { %v2675_v38 = vpop.f32.mrf.mxu0  ;;  %v2723_v48 = vadd.f32 %v2714_v37, %v4382_v55  ;;  %v3086_v37 = vpop.xlane.xlu1 %3085 }
 0x6e8   :  { %v3458_v39 = vmul.f32 -1.442695, %v2721_v36  ;;  %v2722_v40 = vadd.f32 %v2675_v38, %v4386_v7  ;;  %v2716_v41 = vpop.f32.mrf.mxu1 }
 0x6e9   :  { %v2677_v42 = vpop.f32.mrf.mxu0  ;;  %v2724_v47 = vadd.f32 %v2716_v41, %v4389_v29 }
 0x6ea   :  { %3793 = vpow2.f32 %v3458_v39  ;;  %v3459_v43 = vmul.f32 -1.442695, %v2722_v40  ;;  %v2718_v45 = vpop.f32.mrf.mxu1  ;;  %v4976_v40 = vlaneseq }
 0x6eb   :  { %v2678_v22 = vpop.f32.mrf.mxu0  ;;  %v3460_v49 = vmul.f32 -1.442695, %v2724_v47  ;;  %v3092_v38 = vpop.xlane.xlu1 %3091  ;;  %v4977_v45 = vld [vmem:[#allocation9_spill] sm:$0xff] }
 0x6ec   :  { %3795 = vpow2.f32 %v3459_v43  ;;  %v2719_v46 = vpop.f32.mrf.mxu1  ;;  %v3126_v41 = vand.u32 127, %v4976_v40  ;;  %v3084_v43 = vpop.xlane.xlu0 %3083 }
 0x6ed   :  { %3797 = vtanh.f32 %v2723_v48 }
 0x6ee   :  { %3799 = vpow2.f32 %v3460_v49  ;;  %v3129_v22 = vsub.s32 %v3126_v41, %v4977_v45 }
 0x6f0   :  { %v3088_v48 = vpop.xlane.xlu0 %3087 }
 0x6f7   :  { %v3794_v50 = vpop.eup %3793 }
 0x6f8   :  { %v2728_v12 = vadd.f32 1.0, %v3794_v50 }
 0x6f9   :  { %v3796_v51 = vpop.eup %3795 }
 0x6fa   :  { %3801 = vrcp.f32 %v2728_v12  ;;  %v2734_v7 = vadd.f32 1.0, %v3796_v51  ;;  %v3798_v52 = vpop.eup %3797  ;;  %v3090_v51 = vpop.xlane.xlu0 %3089 }
 0x6fb   :  { %v3800_v56 = vpop.eup %3799 }
 0x6fc   :  { %3803 = vrcp.f32 %v2734_v7  ;;  %v2741_v19 = vadd.f32 1.0, %v3800_v56 }
 0x6fe   :  { %3805 = vrcp.f32 %v2741_v19  ;;  %v3094_v19 = vpop.xlane.xlu0 %3093 }
 0x707   :  { %v3802_v57 = vpop.eup %3801 }
 0x708   :  { %v2745_v58 = vmul.f32 %v3802_v57, %v3798_v52 }
 0x709   :  { %v3804_v2 = vpop.eup %3803 }
 0x70a   :  { %v2744_v6 = vmul.f32 %v3804_v2, %v4791_v30 }
 0x70b   :  { %v3806_v55 = vpop.eup %3805 }
 0x70c   :  { %v2746_v29 = vadd.f32 %v2745_v58, %v2744_v6 }
 0x70e   :  { %3807 = vtanh.f32 %v2746_v29 }
 0x71b   :  { %v3808_v1 = vpop.eup %3807 }
 0x71c   :  { %v2748_v31 = vmul.f32 %v3808_v1, %v3806_v55 }
 0x71e   :  { %v3081_v32 = vmul.f32 %v3825_v17, %v2748_v31  ;;  %v2755_v23 = vpack.c.bf16 %v2748_v31, %v2748_v31 }
 0x720   :  { %3095 = vadd.xlane.f32.xlu1 %v3081_v32  ;;  %2981 = vmatmul.mubr.bf16.vlgmr.msra.gmra.mxu0 %v2755_v23 }
 0x721   :  { %3022 = vmatmul.mubr.bf16.vlgmr.msra.gmra.mxu1 %v2755_v23 }
 0x731   :  { %3106 = vperm.xlu1 %3500, %v3497_v15  }
 0x7a9   :  { %v3096_v39 = vpop.xlane.xlu1 %3095 }
 0x7ad   :  { %v3107_v42 = vpop.permute.xlu1 %3106 }
 0x7ae   :  { %v3109_v46 = vadd.f32 %v3107_v42, %v3084_v43  ;;  %v3110_v47 = vadd.f32 %v3107_v42, %v3086_v37  ;;  %v3111_v49 = vadd.f32 %v3107_v42, %v3088_v48  ;;  %v3112_v52 = vadd.f32 %v3107_v42, %v3090_v51 }
 0x7af   :  { %v3113_v57 = vadd.f32 %v3107_v42, %v3092_v38  ;;  %v3114_v6 = vadd.f32 %v3107_v42, %v3094_v19  ;;  %v3115_v1 = vadd.f32 %v3107_v42, %v3096_v39 }
 0x7b0   :  { %v3130_v50 = vrot.slane %v3109_v46, %v3129_v22  ;;  %v3134_v12 = vrot.slane %v3110_v47, %v3129_v22  ;;  %v3138_v7 = vrot.slane %v3111_v49, %v3129_v22  ;;  %v3142_v2 = vrot.slane %v3112_v52, %v3129_v22 }
 0x7b1   :  { %v3146_v55 = vrot.slane %v3113_v57, %v3129_v22 }
 0x7b2   :  { %v3160_v56 = vsel %vm3159_vm0, %v3134_v12, %v3130_v50 }
 0x7b3   :  { %v3162_v58 = vsel %vm3161_vm1, %v3138_v7, %v3160_v56 }
 0x7e0   :  { %v2982_v25 = vpop.f32.mrf.mxu0 }
 0x7e1   :  { %v3030_v30 = vadd.f32 %v2982_v25, %v4393_v9  ;;  %v3023_v33 = vpop.f32.mrf.mxu1  ;;  %v3154_v25 = vrot.slane %v3115_v1, %v3129_v22 }
 0x7e2   :  { %v2984_v20 = vpop.f32.mrf.mxu0  ;;  %v3032_v61 = vadd.f32 %v3023_v33, %v4975_v60 }
 0x7e3   :  { %v3493_v0 = vmul.f32 -1.442695, %v3030_v30  ;;  %v3031_v11 = vadd.f32 %v2984_v20, %v4400_v54  ;;  %v3025_v8 = vpop.f32.mrf.mxu1 }
 0x7e4   :  { %v2986_v18 = vpop.f32.mrf.mxu0  ;;  %v3033_v35 = vadd.f32 %v3025_v8, %v4403_v3 }
 0x7e5   :  { %3809 = vpow2.f32 %v3493_v0  ;;  %v3494_v26 = vmul.f32 -1.442695, %v3031_v11  ;;  %v3027_v10 = vpop.f32.mrf.mxu1 }
 0x7e6   :  { %v2987_v59 = vpop.f32.mrf.mxu0  ;;  %v3495_v4 = vmul.f32 -1.442695, %v3033_v35 }
 0x7e7   :  { %3811 = vpow2.f32 %v3494_v26  ;;  %v3028_v34 = vpop.f32.mrf.mxu1 }
 0x7e8   :  { %3813 = vtanh.f32 %v3032_v61 }
 0x7e9   :  { %3815 = vpow2.f32 %v3495_v4 }
 0x7f2   :  { %v3810_v5 = vpop.eup %3809 }
 0x7f3   :  { %v3037_v9 = vadd.f32 1.0, %v3810_v5 }
 0x7f4   :  { %v3812_v16 = vpop.eup %3811 }
 0x7f5   :  { %3817 = vrcp.f32 %v3037_v9  ;;  %v3043_v54 = vadd.f32 1.0, %v3812_v16  ;;  %v3814_v21 = vpop.eup %3813 }
 0x7f6   :  { %v3816_v63 = vpop.eup %3815 }
 0x7f7   :  { %3819 = vrcp.f32 %v3043_v54  ;;  %v3050_v53 = vadd.f32 1.0, %v3816_v63 }
 0x7f9   :  { %3821 = vrcp.f32 %v3050_v53 }
 0x802   :  { %v3818_v24 = vpop.eup %3817 }
 0x803   :  { %v3054_v28 = vmul.f32 %v3818_v24, %v3814_v21 }
 0x804   :  { %v3820_v62 = vpop.eup %3819 }
 0x805   :  { %v3053_v14 = vmul.f32 %v3820_v62, %v2746_v29  ;;  %v3164_v29 = vsel %vm3163_vm2, %v3142_v2, %v3162_v58 }
 0x806   :  { %v3822_v3 = vpop.eup %3821  ;;  %v3166_v31 = vsel %vm3165_vm3, %v3146_v55, %v3164_v29 }
 0x807   :  { %v3055_v44 = vadd.f32 %v3054_v28, %v3053_v14 }
 0x809   :  { %3823 = vtanh.f32 %v3055_v44 }
 0x816   :  { %v3824_v13 = vpop.eup %3823 }
 0x817   :  { %v3057_v27 = vmul.f32 %v3824_v13, %v3822_v3 }
 0x819   :  { %v3082_v36 = vmul.f32 %v3825_v17, %v3057_v27  ;;  %v3150_v17 = vrot.slane %v3114_v6, %v3129_v22 }
 0x81b   :  { %3097 = vadd.xlane.f32.xlu0 %v3082_v36  ;;  %v3168_v23 = vsel %vm3167_vm4, %v3150_v17, %v3166_v31 }
 0x81c   :  { %v3170_v33 = vsel %vm3169_vm5, %v3154_v25, %v3168_v23 }
 0x8a4   :  { %v3098_v32 = vpop.xlane.xlu0 %3097 }
 0x8a5   :  { %v3116_v15 = vadd.f32 %v3107_v42, %v3098_v32 }
 0x8a7   :  { %v3158_v30 = vrot.slane %v3116_v15, %v3129_v22 }
 0x8a9   :  { %v3172_v20 = vsel %vm3171_vm6, %v3158_v30, %v3170_v33 }
 0x8aa   :  { %3175 = vst.msk [vmem:[%s4921_s8] sm:$0xff] %vm3174_vm7, %v3172_v20 }

</bundles_post_ra>
